<compile_context>
chip_gen: v6e
topology: v6e:2x2x1
jax: 0.10.0
libtpu: 0.0.40
codegen_flags: <defaults>
</compile_context>

<pallas_src>
import jax
import jax.numpy as jnp
from jax.experimental import pallas as pl
from jax.experimental.pallas import tpu as pltpu

# ---------------- model hyper-params (small, consistent with the module) ----
NUM_INPUTS = 32
NUM_ACTIONS = 4
NUM_ATOMS = 8
HIDDEN1 = 128
HIDDEN2 = 128
NOISY1_OUT = 512
NOISY2_OUT = NUM_ACTIONS * NUM_ATOMS      # 32 meaningful output lanes
OUT_PAD = 128                             # lane-dense padded output width
VMIN, VMAX = -10.0, 10.0                  # unused in forward; parity with __init__


def _round_up(n, m):
    return ((n + m - 1) // m) * m


def _cdiv(a, b):
    return -(-a // b)


def categorical_dqn_kernel(x_ref,
                           w1_ref, b1_ref,
                           w2_ref, b2_ref,
                           w3_ref, b3_ref,
                           w4_ref, b4_ref,
                           out_ref):
    # bf16 matmuls on the MXU with f32 accumulation; elementwise math in f32
    # (v5e-safe: no bf16 VPU there).
    x = x_ref[...].astype(jnp.bfloat16)                                    # (TB, 32)

    h = jnp.dot(x, w1_ref[...], preferred_element_type=jnp.float32) + b1_ref[...]
    h = jnp.maximum(h, 0.0)                                                # relu

    h = jnp.dot(h.astype(jnp.bfloat16), w2_ref[...],
                preferred_element_type=jnp.float32) + b2_ref[...]
    h = jnp.maximum(h, 0.0)

    h = jnp.dot(h.astype(jnp.bfloat16), w3_ref[...],
                preferred_element_type=jnp.float32) + b3_ref[...]
    h = jnp.maximum(h, 0.0)

    # Final layer is zero-padded to 128 output lanes -> unmasked full-vreg
    # stores; only lanes 0..31 are meaningful (padded W4/b4 columns are zero).
    logits = jnp.dot(h.astype(jnp.bfloat16), w4_ref[...],
                     preferred_element_type=jnp.float32) + b4_ref[...]     # (TB, 128)

    # Grouped softmax over the atom dimension on static lane slices of the
    # first 32 lanes (no (TB*A, N) relayout).  Divide -> reciprocal-multiply
    # on the EUP slot (approx, ~1e-3 relative accuracy).
    tb = logits.shape[0]
    parts = []
    for a in range(NUM_ACTIONS):
        g = logits[:, a * NUM_ATOMS:(a + 1) * NUM_ATOMS]                   # (TB, 8)
        m = jnp.max(g, axis=-1, keepdims=True)
        e = jnp.exp(g - m)
        s = jnp.sum(e, axis=-1, keepdims=True)
        parts.append(e * pl.reciprocal(s, approx=True))
    parts.append(jnp.zeros((tb, OUT_PAD - NOISY2_OUT), jnp.float32))       # pad lanes
    out_ref[...] = jnp.concatenate(parts, axis=-1).astype(out_ref.dtype)   # (TB, 128)


def _choose_tiling(B, block_batch):
    """Balanced batch tiles: minimal tail pad, even tile count when >1."""
    n_tiles = _cdiv(B, block_batch)
    if B >= 1024:
        n_tiles = max(n_tiles, 2)        # keep >=2 steps so v7x can use both TCs
    if n_tiles > 1 and n_tiles % 2 == 1:
        n_tiles += 1                     # even number of tiles -> balanced TC split
    TB = _round_up(_cdiv(B, n_tiles), 8)
    return n_tiles, TB, n_tiles * TB


def _vmem_limit_bytes(TB):
    """Scoped-VMEM limit sized for the tile, capped per TPU generation."""
    needed = TB * 8 * 1024 + (4 << 20)   # ~8 KB/row activations + weights + slack
    try:
        phys = int(getattr(pltpu.get_tpu_info(), "vmem_capacity_bytes", 64 << 20))
    except Exception:
        phys = 64 << 20
    cap = (48 << 20) if phys <= (64 << 20) else (100 << 20)   # v7x vs v5e/v6e
    return int(min(max(needed, 32 << 20), cap))


def categorical_dqn_forward(x, params, *, block_batch=2048, min_pallas_batch=256):
    """x: (B, NUM_INPUTS) float32.  Returns (B, NUM_ACTIONS, NUM_ATOMS) f32."""
    (w1, b1), (w2, b2), (w3, b3), (w4, b4) = params
    B = x.shape[0]

    # Tiny batches: the whole net is ~200 KB of weights and a few hundred
    # KFLOP/row, so pallas launch + pipeline fixed cost dominates -- let XLA's
    # fused matmuls handle it.
    if B < min_pallas_batch:
        return reference_forward(x, params)

    n_tiles, TB, B_pad = _choose_tiling(B, block_batch)
    if B_pad != B:
        x = jnp.pad(x, ((0, B_pad - B), (0, 0)))

    # Lane-dense final layer: zero-pad W4/b4 to 128 output columns.
    w4p = jnp.pad(w4, ((0, 0), (0, OUT_PAD - NOISY2_OUT)))
    b4p = jnp.pad(b4, ((0, 0), (0, OUT_PAD - NOISY2_OUT)))

    row_map = lambda i: (i, 0)     # batch-tiled operands (x, out)
    const_map = lambda i: (0, 0)   # weights/biases: loaded once, VMEM-resident

    def run(single_buffer_weights):
        wkw = dict(pipeline_mode=pl.Buffered(1)) if single_buffer_weights else {}
        return pl.pallas_call(
            categorical_dqn_kernel,
            out_shape=jax.ShapeDtypeStruct((B_pad, OUT_PAD), jnp.float32),
            grid=(n_tiles,),
            in_specs=[
                pl.BlockSpec((TB, NUM_INPUTS), row_map),
                pl.BlockSpec((NUM_INPUTS, HIDDEN1), const_map, **wkw),
                pl.BlockSpec((1, HIDDEN1), const_map, **wkw),
                pl.BlockSpec((HIDDEN1, HIDDEN2), const_map, **wkw),
                pl.BlockSpec((1, HIDDEN2), const_map, **wkw),
                pl.BlockSpec((HIDDEN2, NOISY1_OUT), const_map, **wkw),
                pl.BlockSpec((1, NOISY1_OUT), const_map, **wkw),
                pl.BlockSpec((NOISY1_OUT, OUT_PAD), const_map, **wkw),
                pl.BlockSpec((1, OUT_PAD), const_map, **wkw),
            ],
            out_specs=pl.BlockSpec((TB, OUT_PAD), row_map),
            compiler_params=pltpu.CompilerParams(
                dimension_semantics=("parallel",),  # v7x: batch tiles across TCs
                vmem_limit_bytes=_vmem_limit_bytes(TB),
            ),
        )(x, w1, b1, w2, b2, w3, b3, w4p, b4p)

    try:
        # Constant-index weights never change block -> single buffer saves
        # ~300 KB VMEM (pure headroom; no speed effect by itself).
        out = run(True)
    except Exception:
        # Perf-neutral fallback if this JAX build rejects pl.Buffered(1) here.
        out = run(False)

    return out[:B, :NOISY2_OUT].reshape(B, NUM_ACTIONS, NUM_ATOMS)


def init_params(key):
    """Deterministic synthetic parameters.

    Weights returned as [in_features, out_features] in bfloat16 (transposed vs
    PyTorch); biases as [1, out_features] float32.  Noisy layers are folded:
    W = W_mu + W_sigma * eps (factorized gaussian noise), b = b_mu + b_sigma*eps.
    """
    def linear(key, fan_in, fan_out):
        kw, kb = jax.random.split(key)
        bound = 1.0 / jnp.sqrt(fan_in)
        w = jax.random.uniform(kw, (fan_in, fan_out), jnp.float32, -bound, bound)
        b = jax.random.uniform(kb, (1, fan_out), jnp.float32, -bound, bound)
        return w.astype(jnp.bfloat16), b

    def noisy_linear(key, fan_in, fan_out, sigma0=0.5):
        kmu, kb, ke_in, ke_out = jax.random.split(key, 4)
        mu_bound = 1.0 / jnp.sqrt(fan_in)
        w_mu = jax.random.uniform(kmu, (fan_in, fan_out), jnp.float32,
                                  -mu_bound, mu_bound)
        b_mu = jax.random.uniform(kb, (1, fan_out), jnp.float32,
                                  -mu_bound, mu_bound)
        w_sigma = jnp.full((fan_in, fan_out), sigma0 / jnp.sqrt(fan_in), jnp.float32)
        b_sigma = jnp.full((1, fan_out), sigma0 / jnp.sqrt(fan_out), jnp.float32)

        def f(v):  # factorized gaussian noise f(x) = sign(x)*sqrt(|x|)
            return jnp.sign(v) * jnp.sqrt(jnp.abs(v))

        eps_in = f(jax.random.normal(ke_in, (fan_in,), jnp.float32))
        eps_out = f(jax.random.normal(ke_out, (fan_out,), jnp.float32))
        w_eps = eps_in[:, None] * eps_out[None, :]
        w = w_mu + w_sigma * w_eps
        b = b_mu + b_sigma * eps_out[None, :]
        return w.astype(jnp.bfloat16), b

    k1, k2, k3, k4 = jax.random.split(key, 4)
    return (
        linear(k1, NUM_INPUTS, HIDDEN1),
        linear(k2, HIDDEN1, HIDDEN2),
        noisy_linear(k3, HIDDEN2, NOISY1_OUT),
        noisy_linear(k4, NOISY1_OUT, NOISY2_OUT),
    )


def reference_forward(x, params):
    """Pure-JAX reference using the same (bf16 weight, f32 accum) recipe.

    Also serves as the small-batch fallback path.
    """
    (w1, b1), (w2, b2), (w3, b3), (w4, b4) = params
    h = jnp.maximum(jnp.dot(x.astype(jnp.bfloat16), w1,
                            preferred_element_type=jnp.float32) + b1, 0.0)
    h = jnp.maximum(jnp.dot(h.astype(jnp.bfloat16), w2,
                            preferred_element_type=jnp.float32) + b2, 0.0)
    h = jnp.maximum(jnp.dot(h.astype(jnp.bfloat16), w3,
                            preferred_element_type=jnp.float32) + b3, 0.0)
    logits = jnp.dot(h.astype(jnp.bfloat16), w4,
                     preferred_element_type=jnp.float32) + b4
    probs = jax.nn.softmax(logits.reshape(-1, NUM_ATOMS), axis=-1)
    return probs.reshape(-1, NUM_ACTIONS, NUM_ATOMS)


if __name__ == "__main__":
    key = jax.random.PRNGKey(0)
    kx, kp, kx2 = jax.random.split(key, 3)
    params = init_params(kp)

    # Small shape consistent with the module: batch=2, num_inputs=32.
    batch = 2
    x = jax.random.normal(kx, (batch, NUM_INPUTS), jnp.float32)
    ref = reference_forward(x, params)

    # 1) Force the Pallas path at the small batch (exercise the kernel itself).
    out = jax.block_until_ready(
        categorical_dqn_forward(x, params, min_pallas_batch=0))
    assert out.shape == (batch, NUM_ACTIONS, NUM_ATOMS)
    # Approx reciprocal in the softmax -> tolerance loosened vs exact divide.
    assert bool(jnp.allclose(jnp.sum(out, axis=-1), 1.0, atol=5e-3))
    assert bool(jnp.allclose(out, ref, atol=5e-3, rtol=5e-3))

    # 2) Default dispatch at tiny batch uses the plain-JAX fallback.
    out_fb = jax.block_until_ready(categorical_dqn_forward(x, params))
    assert out_fb.shape == (batch, NUM_ACTIONS, NUM_ATOMS)
    assert bool(jnp.allclose(out_fb, ref, atol=5e-3, rtol=5e-3))

    # 3) Awkward batch size exercising the balanced multi-tile grid
    #    (B=600, block_batch=256 -> 4 tiles of TB=152, minimal tail pad).
    xb = jax.random.normal(kx2, (600, NUM_INPUTS), jnp.float32)
    out_b = jax.block_until_ready(
        categorical_dqn_forward(xb, params, block_batch=256))
    ref_b = reference_forward(xb, params)
    assert out_b.shape == (600, NUM_ACTIONS, NUM_ATOMS)
    assert bool(jnp.allclose(jnp.sum(out_b, axis=-1), 1.0, atol=5e-3))
    assert bool(jnp.allclose(out_b, ref_b, atol=5e-3, rtol=5e-3))

    print("KERNEL_OK")
</pallas_src>

<mosaic_0001>
module attributes {stable_mosaic.version = 11 : i64} {
  func.func @categorical_dqn_kernel(%arg0: i32, %arg1: memref<8x32xf32, #tpu.memory_space<vmem>>, %arg2: memref<32x128xbf16, #tpu.memory_space<vmem>>, %arg3: memref<1x128xf32, #tpu.memory_space<vmem>>, %arg4: memref<128x128xbf16, #tpu.memory_space<vmem>>, %arg5: memref<1x128xf32, #tpu.memory_space<vmem>>, %arg6: memref<128x512xbf16, #tpu.memory_space<vmem>>, %arg7: memref<1x512xf32, #tpu.memory_space<vmem>>, %arg8: memref<512x128xbf16, #tpu.memory_space<vmem>>, %arg9: memref<1x128xf32, #tpu.memory_space<vmem>>, %arg10: memref<8x128xf32, #tpu.memory_space<vmem>>) attributes {dimension_semantics = [#tpu.dimension_semantics<parallel>], iteration_bounds = array<i64: 1>, scalar_prefetch = 0 : i64, scratch_operands = 0 : i64, tpu.core_type = #tpu.core_type<tc>, window_params = [{transform_indices = @transform_0, window_bounds = array<i64: 8, 32>}, {pipeline_mode = #tpu.pipeline_mode<synchronous>, transform_indices = @transform_1, window_bounds = array<i64: 32, 128>}, {pipeline_mode = #tpu.pipeline_mode<synchronous>, transform_indices = @transform_2, window_bounds = array<i64: 1, 128>}, {pipeline_mode = #tpu.pipeline_mode<synchronous>, transform_indices = @transform_3, window_bounds = array<i64: 128, 128>}, {pipeline_mode = #tpu.pipeline_mode<synchronous>, transform_indices = @transform_4, window_bounds = array<i64: 1, 128>}, {pipeline_mode = #tpu.pipeline_mode<synchronous>, transform_indices = @transform_5, window_bounds = array<i64: 128, 512>}, {pipeline_mode = #tpu.pipeline_mode<synchronous>, transform_indices = @transform_6, window_bounds = array<i64: 1, 512>}, {pipeline_mode = #tpu.pipeline_mode<synchronous>, transform_indices = @transform_7, window_bounds = array<i64: 512, 128>}, {pipeline_mode = #tpu.pipeline_mode<synchronous>, transform_indices = @transform_8, window_bounds = array<i64: 1, 128>}, {transform_indices = @transform_9, window_bounds = array<i64: 8, 128>}]} {
    %c0 = arith.constant 0 : index
    %c0_0 = arith.constant 0 : index
    %0 = vector.load %arg1[%c0, %c0_0] : memref<8x32xf32, #tpu.memory_space<vmem>>, vector<8x32xf32>
    %1 = arith.truncf %0 : vector<8x32xf32> to vector<8x32xbf16>
    %c0_1 = arith.constant 0 : index
    %c0_2 = arith.constant 0 : index
    %2 = vector.load %arg2[%c0_1, %c0_2] : memref<32x128xbf16, #tpu.memory_space<vmem>>, vector<32x128xbf16>
    %cst = arith.constant dense<0.000000e+00> : vector<8x128xf32>
    %3 = tpu.matmul %1, %2, %cst {dimension_numbers = #tpu.dot_dimension_numbers<[1], [0], [0], [1], [0, 0, 1, 1], [], []>} : vector<8x32xbf16>, vector<32x128xbf16>, vector<8x128xf32> -> vector<8x128xf32>
    %c0_3 = arith.constant 0 : index
    %c0_4 = arith.constant 0 : index
    %4 = vector.load %arg3[%c0_3, %c0_4] : memref<1x128xf32, #tpu.memory_space<vmem>>, vector<1x128xf32>
    %5 = vector.broadcast %4 : vector<1x128xf32> to vector<8x128xf32>
    %6 = arith.addf %3, %5 : vector<8x128xf32>
    %cst_5 = arith.constant 0.000000e+00 : f32
    %7 = vector.broadcast %cst_5 : f32 to vector<8x128xf32>
    %8 = arith.maximumf %6, %7 : vector<8x128xf32>
    %9 = arith.truncf %8 : vector<8x128xf32> to vector<8x128xbf16>
    %c0_6 = arith.constant 0 : index
    %c0_7 = arith.constant 0 : index
    %10 = vector.load %arg4[%c0_6, %c0_7] : memref<128x128xbf16, #tpu.memory_space<vmem>>, vector<128x128xbf16>
    %cst_8 = arith.constant dense<0.000000e+00> : vector<8x128xf32>
    %11 = tpu.matmul %9, %10, %cst_8 {dimension_numbers = #tpu.dot_dimension_numbers<[1], [0], [0], [1], [0, 0, 1, 1], [], []>} : vector<8x128xbf16>, vector<128x128xbf16>, vector<8x128xf32> -> vector<8x128xf32>
    %c0_9 = arith.constant 0 : index
    %c0_10 = arith.constant 0 : index
    %12 = vector.load %arg5[%c0_9, %c0_10] : memref<1x128xf32, #tpu.memory_space<vmem>>, vector<1x128xf32>
    %13 = vector.broadcast %12 : vector<1x128xf32> to vector<8x128xf32>
    %14 = arith.addf %11, %13 : vector<8x128xf32>
    %cst_11 = arith.constant 0.000000e+00 : f32
    %15 = vector.broadcast %cst_11 : f32 to vector<8x128xf32>
    %16 = arith.maximumf %14, %15 : vector<8x128xf32>
    %17 = arith.truncf %16 : vector<8x128xf32> to vector<8x128xbf16>
    %c0_12 = arith.constant 0 : index
    %c0_13 = arith.constant 0 : index
    %18 = vector.load %arg6[%c0_12, %c0_13] : memref<128x512xbf16, #tpu.memory_space<vmem>>, vector<128x512xbf16>
    %cst_14 = arith.constant dense<0.000000e+00> : vector<8x512xf32>
    %19 = tpu.matmul %17, %18, %cst_14 {dimension_numbers = #tpu.dot_dimension_numbers<[1], [0], [0], [1], [0, 0, 1, 1], [], []>} : vector<8x128xbf16>, vector<128x512xbf16>, vector<8x512xf32> -> vector<8x512xf32>
    %c0_15 = arith.constant 0 : index
    %c0_16 = arith.constant 0 : index
    %20 = vector.load %arg7[%c0_15, %c0_16] : memref<1x512xf32, #tpu.memory_space<vmem>>, vector<1x512xf32>
    %21 = vector.broadcast %20 : vector<1x512xf32> to vector<8x512xf32>
    %22 = arith.addf %19, %21 : vector<8x512xf32>
    %cst_17 = arith.constant 0.000000e+00 : f32
    %23 = vector.broadcast %cst_17 : f32 to vector<8x512xf32>
    %24 = arith.maximumf %22, %23 : vector<8x512xf32>
    %25 = arith.truncf %24 : vector<8x512xf32> to vector<8x512xbf16>
    %c0_18 = arith.constant 0 : index
    %c0_19 = arith.constant 0 : index
    %26 = vector.load %arg8[%c0_18, %c0_19] : memref<512x128xbf16, #tpu.memory_space<vmem>>, vector<512x128xbf16>
    %cst_20 = arith.constant dense<0.000000e+00> : vector<8x128xf32>
    %27 = tpu.matmul %25, %26, %cst_20 {dimension_numbers = #tpu.dot_dimension_numbers<[1], [0], [0], [1], [0, 0, 1, 1], [], []>} : vector<8x512xbf16>, vector<512x128xbf16>, vector<8x128xf32> -> vector<8x128xf32>
    %c0_21 = arith.constant 0 : index
    %c0_22 = arith.constant 0 : index
    %28 = vector.load %arg9[%c0_21, %c0_22] : memref<1x128xf32, #tpu.memory_space<vmem>>, vector<1x128xf32>
    %29 = vector.broadcast %28 : vector<1x128xf32> to vector<8x128xf32>
    %30 = arith.addf %27, %29 : vector<8x128xf32>
    %31 = vector.extract_strided_slice %30 {offsets = [0, 0], sizes = [8, 8], strides = [1, 1]} : vector<8x128xf32> to vector<8x8xf32>
    %cst_23 = arith.constant dense<0xFF800000> : vector<8xf32>
    %32 = vector.multi_reduction <maximumf>, %31, %cst_23 [1] : vector<8x8xf32> to vector<8xf32>
    %33 = vector.shape_cast %32 : vector<8xf32> to vector<8x1xf32>
    %34 = vector.broadcast %33 : vector<8x1xf32> to vector<8x8xf32>
    %35 = arith.subf %31, %34 : vector<8x8xf32>
    %36 = math.exp %35 : vector<8x8xf32>
    %cst_24 = arith.constant dense<0.000000e+00> : vector<8xf32>
    %37 = vector.multi_reduction <add>, %36, %cst_24 [1] : vector<8x8xf32> to vector<8xf32>
    %38 = vector.shape_cast %37 : vector<8xf32> to vector<8x1xf32>
    %39 = tpu.reciprocal %38 {approx = true} : vector<8x1xf32> -> vector<8x1xf32>
    %40 = vector.broadcast %39 : vector<8x1xf32> to vector<8x8xf32>
    %41 = arith.mulf %36, %40 : vector<8x8xf32>
    %42 = vector.extract_strided_slice %30 {offsets = [0, 8], sizes = [8, 8], strides = [1, 1]} : vector<8x128xf32> to vector<8x8xf32>
    %cst_25 = arith.constant dense<0xFF800000> : vector<8xf32>
    %43 = vector.multi_reduction <maximumf>, %42, %cst_25 [1] : vector<8x8xf32> to vector<8xf32>
    %44 = vector.shape_cast %43 : vector<8xf32> to vector<8x1xf32>
    %45 = vector.broadcast %44 : vector<8x1xf32> to vector<8x8xf32>
    %46 = arith.subf %42, %45 : vector<8x8xf32>
    %47 = math.exp %46 : vector<8x8xf32>
    %cst_26 = arith.constant dense<0.000000e+00> : vector<8xf32>
    %48 = vector.multi_reduction <add>, %47, %cst_26 [1] : vector<8x8xf32> to vector<8xf32>
    %49 = vector.shape_cast %48 : vector<8xf32> to vector<8x1xf32>
    %50 = tpu.reciprocal %49 {approx = true} : vector<8x1xf32> -> vector<8x1xf32>
    %51 = vector.broadcast %50 : vector<8x1xf32> to vector<8x8xf32>
    %52 = arith.mulf %47, %51 : vector<8x8xf32>
    %53 = vector.extract_strided_slice %30 {offsets = [0, 16], sizes = [8, 8], strides = [1, 1]} : vector<8x128xf32> to vector<8x8xf32>
    %cst_27 = arith.constant dense<0xFF800000> : vector<8xf32>
    %54 = vector.multi_reduction <maximumf>, %53, %cst_27 [1] : vector<8x8xf32> to vector<8xf32>
    %55 = vector.shape_cast %54 : vector<8xf32> to vector<8x1xf32>
    %56 = vector.broadcast %55 : vector<8x1xf32> to vector<8x8xf32>
    %57 = arith.subf %53, %56 : vector<8x8xf32>
    %58 = math.exp %57 : vector<8x8xf32>
    %cst_28 = arith.constant dense<0.000000e+00> : vector<8xf32>
    %59 = vector.multi_reduction <add>, %58, %cst_28 [1] : vector<8x8xf32> to vector<8xf32>
    %60 = vector.shape_cast %59 : vector<8xf32> to vector<8x1xf32>
    %61 = tpu.reciprocal %60 {approx = true} : vector<8x1xf32> -> vector<8x1xf32>
    %62 = vector.broadcast %61 : vector<8x1xf32> to vector<8x8xf32>
    %63 = arith.mulf %58, %62 : vector<8x8xf32>
    %64 = vector.extract_strided_slice %30 {offsets = [0, 24], sizes = [8, 8], strides = [1, 1]} : vector<8x128xf32> to vector<8x8xf32>
    %cst_29 = arith.constant dense<0xFF800000> : vector<8xf32>
    %65 = vector.multi_reduction <maximumf>, %64, %cst_29 [1] : vector<8x8xf32> to vector<8xf32>
    %66 = vector.shape_cast %65 : vector<8xf32> to vector<8x1xf32>
    %67 = vector.broadcast %66 : vector<8x1xf32> to vector<8x8xf32>
    %68 = arith.subf %64, %67 : vector<8x8xf32>
    %69 = math.exp %68 : vector<8x8xf32>
    %cst_30 = arith.constant dense<0.000000e+00> : vector<8xf32>
    %70 = vector.multi_reduction <add>, %69, %cst_30 [1] : vector<8x8xf32> to vector<8xf32>
    %71 = vector.shape_cast %70 : vector<8xf32> to vector<8x1xf32>
    %72 = tpu.reciprocal %71 {approx = true} : vector<8x1xf32> -> vector<8x1xf32>
    %73 = vector.broadcast %72 : vector<8x1xf32> to vector<8x8xf32>
    %74 = arith.mulf %69, %73 : vector<8x8xf32>
    %cst_31 = arith.constant 0.000000e+00 : f32
    %75 = vector.broadcast %cst_31 : f32 to vector<8x96xf32>
    %76 = tpu.concatenate %41, %52, %63, %74, %75 in 1 : vector<8x8xf32>, vector<8x8xf32>, vector<8x8xf32>, vector<8x8xf32>, vector<8x96xf32> -> vector<8x128xf32>
    %c0_32 = arith.constant 0 : index
    %c0_33 = arith.constant 0 : index
    %77 = vector.load %arg10[%c0_32, %c0_33] : memref<8x128xf32, #tpu.memory_space<vmem>>, vector<8x128xf32>
    tpu.vector_store %arg10[%c0_32, %c0_33], %76 {strides = array<i32>} : memref<8x128xf32, #tpu.memory_space<vmem>>, vector<8x128xf32>,
    return
  }
  func.func @transform_0(%arg0: i32) -> (i32, i32) {
    %c0_i32 = arith.constant 0 : i32
    %c0_i32_0 = arith.constant 0 : i32
    return %arg0, %c0_i32 : i32, i32
  }
  func.func @transform_1(%arg0: i32) -> (i32, i32) {
    %c0_i32 = arith.constant 0 : i32
    %c0_i32_0 = arith.constant 0 : i32
    %c0_i32_1 = arith.constant 0 : i32
    return %c0_i32, %c0_i32_0 : i32, i32
  }
  func.func @transform_2(%arg0: i32) -> (i32, i32) {
    %c0_i32 = arith.constant 0 : i32
    %c0_i32_0 = arith.constant 0 : i32
    %c0_i32_1 = arith.constant 0 : i32
    return %c0_i32, %c0_i32_0 : i32, i32
  }
  func.func @transform_3(%arg0: i32) -> (i32, i32) {
    %c0_i32 = arith.constant 0 : i32
    %c0_i32_0 = arith.constant 0 : i32
    %c0_i32_1 = arith.constant 0 : i32
    return %c0_i32, %c0_i32_0 : i32, i32
  }
  func.func @transform_4(%arg0: i32) -> (i32, i32) {
    %c0_i32 = arith.constant 0 : i32
    %c0_i32_0 = arith.constant 0 : i32
    %c0_i32_1 = arith.constant 0 : i32
    return %c0_i32, %c0_i32_0 : i32, i32
  }
  func.func @transform_5(%arg0: i32) -> (i32, i32) {
    %c0_i32 = arith.constant 0 : i32
    %c0_i32_0 = arith.constant 0 : i32
    %c0_i32_1 = arith.constant 0 : i32
    return %c0_i32, %c0_i32_0 : i32, i32
  }
  func.func @transform_6(%arg0: i32) -> (i32, i32) {
    %c0_i32 = arith.constant 0 : i32
    %c0_i32_0 = arith.constant 0 : i32
    %c0_i32_1 = arith.constant 0 : i32
    return %c0_i32, %c0_i32_0 : i32, i32
  }
  func.func @transform_7(%arg0: i32) -> (i32, i32) {
    %c0_i32 = arith.constant 0 : i32
    %c0_i32_0 = arith.constant 0 : i32
    %c0_i32_1 = arith.constant 0 : i32
    return %c0_i32, %c0_i32_0 : i32, i32
  }
  func.func @transform_8(%arg0: i32) -> (i32, i32) {
    %c0_i32 = arith.constant 0 : i32
    %c0_i32_0 = arith.constant 0 : i32
    %c0_i32_1 = arith.constant 0 : i32
    return %c0_i32, %c0_i32_0 : i32, i32
  }
  func.func @transform_9(%arg0: i32) -> (i32, i32) {
    %c0_i32 = arith.constant 0 : i32
    %c0_i32_0 = arith.constant 0 : i32
    return %arg0, %c0_i32 : i32, i32
  }
}

module attributes {stable_mosaic.version = 11 : i64} {
  func.func @categorical_dqn_kernel(%arg0: i32, %arg1: memref<8x32xf32, #tpu.memory_space<vmem>>, %arg2: memref<32x128xbf16, #tpu.memory_space<vmem>>, %arg3: memref<1x128xf32, #tpu.memory_space<vmem>>, %arg4: memref<128x128xbf16, #tpu.memory_space<vmem>>, %arg5: memref<1x128xf32, #tpu.memory_space<vmem>>, %arg6: memref<128x512xbf16, #tpu.memory_space<vmem>>, %arg7: memref<1x512xf32, #tpu.memory_space<vmem>>, %arg8: memref<512x128xbf16, #tpu.memory_space<vmem>>, %arg9: memref<1x128xf32, #tpu.memory_space<vmem>>, %arg10: memref<8x128xf32, #tpu.memory_space<vmem>>) attributes {dimension_semantics = [#tpu.dimension_semantics<parallel>], iteration_bounds = array<i64: 1>, scalar_prefetch = 0 : i64, scratch_operands = 0 : i64, tpu.core_type = #tpu.core_type<tc>, window_params = [{transform_indices = @transform_0, window_bounds = array<i64: 8, 32>}, {pipeline_mode = #tpu.pipeline_mode<synchronous>, transform_indices = @transform_1, window_bounds = array<i64: 32, 128>}, {pipeline_mode = #tpu.pipeline_mode<synchronous>, transform_indices = @transform_2, window_bounds = array<i64: 1, 128>}, {pipeline_mode = #tpu.pipeline_mode<synchronous>, transform_indices = @transform_3, window_bounds = array<i64: 128, 128>}, {pipeline_mode = #tpu.pipeline_mode<synchronous>, transform_indices = @transform_4, window_bounds = array<i64: 1, 128>}, {pipeline_mode = #tpu.pipeline_mode<synchronous>, transform_indices = @transform_5, window_bounds = array<i64: 128, 512>}, {pipeline_mode = #tpu.pipeline_mode<synchronous>, transform_indices = @transform_6, window_bounds = array<i64: 1, 512>}, {pipeline_mode = #tpu.pipeline_mode<synchronous>, transform_indices = @transform_7, window_bounds = array<i64: 512, 128>}, {pipeline_mode = #tpu.pipeline_mode<synchronous>, transform_indices = @transform_8, window_bounds = array<i64: 1, 128>}, {transform_indices = @transform_9, window_bounds = array<i64: 8, 128>}]} {
    %c0 = arith.constant 0 : index
    %c0_0 = arith.constant 0 : index
    %0 = vector.load %arg1[%c0, %c0_0] : memref<8x32xf32, #tpu.memory_space<vmem>>, vector<8x32xf32>
    %1 = arith.truncf %0 : vector<8x32xf32> to vector<8x32xbf16>
    %c0_1 = arith.constant 0 : index
    %c0_2 = arith.constant 0 : index
    %2 = vector.load %arg2[%c0_1, %c0_2] : memref<32x128xbf16, #tpu.memory_space<vmem>>, vector<32x128xbf16>
    %cst = arith.constant dense<0.000000e+00> : vector<8x128xf32>
    %3 = tpu.matmul %1, %2, %cst {dimension_numbers = #tpu.dot_dimension_numbers<[1], [0], [0], [1], [0, 0, 1, 1], [], []>} : vector<8x32xbf16>, vector<32x128xbf16>, vector<8x128xf32> -> vector<8x128xf32>
    %c0_3 = arith.constant 0 : index
    %c0_4 = arith.constant 0 : index
    %4 = vector.load %arg3[%c0_3, %c0_4] : memref<1x128xf32, #tpu.memory_space<vmem>>, vector<1x128xf32>
    %5 = vector.broadcast %4 : vector<1x128xf32> to vector<8x128xf32>
    %6 = arith.addf %3, %5 : vector<8x128xf32>
    %cst_5 = arith.constant 0.000000e+00 : f32
    %7 = vector.broadcast %cst_5 : f32 to vector<8x128xf32>
    %8 = arith.maximumf %6, %7 : vector<8x128xf32>
    %9 = arith.truncf %8 : vector<8x128xf32> to vector<8x128xbf16>
    %c0_6 = arith.constant 0 : index
    %c0_7 = arith.constant 0 : index
    %10 = vector.load %arg4[%c0_6, %c0_7] : memref<128x128xbf16, #tpu.memory_space<vmem>>, vector<128x128xbf16>
    %cst_8 = arith.constant dense<0.000000e+00> : vector<8x128xf32>
    %11 = tpu.matmul %9, %10, %cst_8 {dimension_numbers = #tpu.dot_dimension_numbers<[1], [0], [0], [1], [0, 0, 1, 1], [], []>} : vector<8x128xbf16>, vector<128x128xbf16>, vector<8x128xf32> -> vector<8x128xf32>
    %c0_9 = arith.constant 0 : index
    %c0_10 = arith.constant 0 : index
    %12 = vector.load %arg5[%c0_9, %c0_10] : memref<1x128xf32, #tpu.memory_space<vmem>>, vector<1x128xf32>
    %13 = vector.broadcast %12 : vector<1x128xf32> to vector<8x128xf32>
    %14 = arith.addf %11, %13 : vector<8x128xf32>
    %cst_11 = arith.constant 0.000000e+00 : f32
    %15 = vector.broadcast %cst_11 : f32 to vector<8x128xf32>
    %16 = arith.maximumf %14, %15 : vector<8x128xf32>
    %17 = arith.truncf %16 : vector<8x128xf32> to vector<8x128xbf16>
    %c0_12 = arith.constant 0 : index
    %c0_13 = arith.constant 0 : index
    %18 = vector.load %arg6[%c0_12, %c0_13] : memref<128x512xbf16, #tpu.memory_space<vmem>>, vector<128x512xbf16>
    %cst_14 = arith.constant dense<0.000000e+00> : vector<8x512xf32>
    %19 = tpu.matmul %17, %18, %cst_14 {dimension_numbers = #tpu.dot_dimension_numbers<[1], [0], [0], [1], [0, 0, 1, 1], [], []>} : vector<8x128xbf16>, vector<128x512xbf16>, vector<8x512xf32> -> vector<8x512xf32>
    %c0_15 = arith.constant 0 : index
    %c0_16 = arith.constant 0 : index
    %20 = vector.load %arg7[%c0_15, %c0_16] : memref<1x512xf32, #tpu.memory_space<vmem>>, vector<1x512xf32>
    %21 = vector.broadcast %20 : vector<1x512xf32> to vector<8x512xf32>
    %22 = arith.addf %19, %21 : vector<8x512xf32>
    %cst_17 = arith.constant 0.000000e+00 : f32
    %23 = vector.broadcast %cst_17 : f32 to vector<8x512xf32>
    %24 = arith.maximumf %22, %23 : vector<8x512xf32>
    %25 = arith.truncf %24 : vector<8x512xf32> to vector<8x512xbf16>
    %c0_18 = arith.constant 0 : index
    %c0_19 = arith.constant 0 : index
    %26 = vector.load %arg8[%c0_18, %c0_19] : memref<512x128xbf16, #tpu.memory_space<vmem>>, vector<512x128xbf16>
    %cst_20 = arith.constant dense<0.000000e+00> : vector<8x128xf32>
    %27 = tpu.matmul %25, %26, %cst_20 {dimension_numbers = #tpu.dot_dimension_numbers<[1], [0], [0], [1], [0, 0, 1, 1], [], []>} : vector<8x512xbf16>, vector<512x128xbf16>, vector<8x128xf32> -> vector<8x128xf32>
    %c0_21 = arith.constant 0 : index
    %c0_22 = arith.constant 0 : index
    %28 = vector.load %arg9[%c0_21, %c0_22] : memref<1x128xf32, #tpu.memory_space<vmem>>, vector<1x128xf32>
    %29 = vector.broadcast %28 : vector<1x128xf32> to vector<8x128xf32>
    %30 = arith.addf %27, %29 : vector<8x128xf32>
    %31 = vector.extract_strided_slice %30 {offsets = [0, 0], sizes = [8, 8], strides = [1, 1]} : vector<8x128xf32> to vector<8x8xf32>
    %cst_23 = arith.constant dense<0xFF800000> : vector<8xf32>
    %32 = vector.multi_reduction <maximumf>, %31, %cst_23 [1] : vector<8x8xf32> to vector<8xf32>
    %33 = vector.shape_cast %32 : vector<8xf32> to vector<8x1xf32>
    %34 = vector.broadcast %33 : vector<8x1xf32> to vector<8x8xf32>
    %35 = arith.subf %31, %34 : vector<8x8xf32>
    %36 = math.exp %35 : vector<8x8xf32>
    %cst_24 = arith.constant dense<0.000000e+00> : vector<8xf32>
    %37 = vector.multi_reduction <add>, %36, %cst_24 [1] : vector<8x8xf32> to vector<8xf32>
    %38 = vector.shape_cast %37 : vector<8xf32> to vector<8x1xf32>
    %39 = tpu.reciprocal %38 {approx = true} : vector<8x1xf32> -> vector<8x1xf32>
    %40 = vector.broadcast %39 : vector<8x1xf32> to vector<8x8xf32>
    %41 = arith.mulf %36, %40 : vector<8x8xf32>
    %42 = vector.extract_strided_slice %30 {offsets = [0, 8], sizes = [8, 8], strides = [1, 1]} : vector<8x128xf32> to vector<8x8xf32>
    %cst_25 = arith.constant dense<0xFF800000> : vector<8xf32>
    %43 = vector.multi_reduction <maximumf>, %42, %cst_25 [1] : vector<8x8xf32> to vector<8xf32>
    %44 = vector.shape_cast %43 : vector<8xf32> to vector<8x1xf32>
    %45 = vector.broadcast %44 : vector<8x1xf32> to vector<8x8xf32>
    %46 = arith.subf %42, %45 : vector<8x8xf32>
    %47 = math.exp %46 : vector<8x8xf32>
    %cst_26 = arith.constant dense<0.000000e+00> : vector<8xf32>
    %48 = vector.multi_reduction <add>, %47, %cst_26 [1] : vector<8x8xf32> to vector<8xf32>
    %49 = vector.shape_cast %48 : vector<8xf32> to vector<8x1xf32>
    %50 = tpu.reciprocal %49 {approx = true} : vector<8x1xf32> -> vector<8x1xf32>
    %51 = vector.broadcast %50 : vector<8x1xf32> to vector<8x8xf32>
    %52 = arith.mulf %47, %51 : vector<8x8xf32>
    %53 = vector.extract_strided_slice %30 {offsets = [0, 16], sizes = [8, 8], strides = [1, 1]} : vector<8x128xf32> to vector<8x8xf32>
    %cst_27 = arith.constant dense<0xFF800000> : vector<8xf32>
    %54 = vector.multi_reduction <maximumf>, %53, %cst_27 [1] : vector<8x8xf32> to vector<8xf32>
    %55 = vector.shape_cast %54 : vector<8xf32> to vector<8x1xf32>
    %56 = vector.broadcast %55 : vector<8x1xf32> to vector<8x8xf32>
    %57 = arith.subf %53, %56 : vector<8x8xf32>
    %58 = math.exp %57 : vector<8x8xf32>
    %cst_28 = arith.constant dense<0.000000e+00> : vector<8xf32>
    %59 = vector.multi_reduction <add>, %58, %cst_28 [1] : vector<8x8xf32> to vector<8xf32>
    %60 = vector.shape_cast %59 : vector<8xf32> to vector<8x1xf32>
    %61 = tpu.reciprocal %60 {approx = true} : vector<8x1xf32> -> vector<8x1xf32>
    %62 = vector.broadcast %61 : vector<8x1xf32> to vector<8x8xf32>
    %63 = arith.mulf %58, %62 : vector<8x8xf32>
    %64 = vector.extract_strided_slice %30 {offsets = [0, 24], sizes = [8, 8], strides = [1, 1]} : vector<8x128xf32> to vector<8x8xf32>
    %cst_29 = arith.constant dense<0xFF800000> : vector<8xf32>
    %65 = vector.multi_reduction <maximumf>, %64, %cst_29 [1] : vector<8x8xf32> to vector<8xf32>
    %66 = vector.shape_cast %65 : vector<8xf32> to vector<8x1xf32>
    %67 = vector.broadcast %66 : vector<8x1xf32> to vector<8x8xf32>
    %68 = arith.subf %64, %67 : vector<8x8xf32>
    %69 = math.exp %68 : vector<8x8xf32>
    %cst_30 = arith.constant dense<0.000000e+00> : vector<8xf32>
    %70 = vector.multi_reduction <add>, %69, %cst_30 [1] : vector<8x8xf32> to vector<8xf32>
    %71 = vector.shape_cast %70 : vector<8xf32> to vector<8x1xf32>
    %72 = tpu.reciprocal %71 {approx = true} : vector<8x1xf32> -> vector<8x1xf32>
    %73 = vector.broadcast %72 : vector<8x1xf32> to vector<8x8xf32>
    %74 = arith.mulf %69, %73 : vector<8x8xf32>
    %cst_31 = arith.constant 0.000000e+00 : f32
    %75 = vector.broadcast %cst_31 : f32 to vector<8x96xf32>
    %76 = tpu.concatenate %41, %52, %63, %74, %75 in 1 : vector<8x8xf32>, vector<8x8xf32>, vector<8x8xf32>, vector<8x8xf32>, vector<8x96xf32> -> vector<8x128xf32>
    %c0_32 = arith.constant 0 : index
    %c0_33 = arith.constant 0 : index
    %77 = vector.load %arg10[%c0_32, %c0_33] : memref<8x128xf32, #tpu.memory_space<vmem>>, vector<8x128xf32>
    tpu.vector_store %arg10[%c0_32, %c0_33], %76 {strides = array<i32>} : memref<8x128xf32, #tpu.memory_space<vmem>>, vector<8x128xf32>,
    return
  }
  func.func @transform_0(%arg0: i32) -> (i32, i32) {
    %c0_i32 = arith.constant 0 : i32
    %c0_i32_0 = arith.constant 0 : i32
    return %arg0, %c0_i32 : i32, i32
  }
  func.func @transform_1(%arg0: i32) -> (i32, i32) {
    %c0_i32 = arith.constant 0 : i32
    %c0_i32_0 = arith.constant 0 : i32
    %c0_i32_1 = arith.constant 0 : i32
    return %c0_i32, %c0_i32_0 : i32, i32
  }
  func.func @transform_2(%arg0: i32) -> (i32, i32) {
    %c0_i32 = arith.constant 0 : i32
    %c0_i32_0 = arith.constant 0 : i32
    %c0_i32_1 = arith.constant 0 : i32
    return %c0_i32, %c0_i32_0 : i32, i32
  }
  func.func @transform_3(%arg0: i32) -> (i32, i32) {
    %c0_i32 = arith.constant 0 : i32
    %c0_i32_0 = arith.constant 0 : i32
    %c0_i32_1 = arith.constant 0 : i32
    return %c0_i32, %c0_i32_0 : i32, i32
  }
  func.func @transform_4(%arg0: i32) -> (i32, i32) {
    %c0_i32 = arith.constant 0 : i32
    %c0_i32_0 = arith.constant 0 : i32
    %c0_i32_1 = arith.constant 0 : i32
    return %c0_i32, %c0_i32_0 : i32, i32
  }
  func.func @transform_5(%arg0: i32) -> (i32, i32) {
    %c0_i32 = arith.constant 0 : i32
    %c0_i32_0 = arith.constant 0 : i32
    %c0_i32_1 = arith.constant 0 : i32
    return %c0_i32, %c0_i32_0 : i32, i32
  }
  func.func @transform_6(%arg0: i32) -> (i32, i32) {
    %c0_i32 = arith.constant 0 : i32
    %c0_i32_0 = arith.constant 0 : i32
    %c0_i32_1 = arith.constant 0 : i32
    return %c0_i32, %c0_i32_0 : i32, i32
  }
  func.func @transform_7(%arg0: i32) -> (i32, i32) {
    %c0_i32 = arith.constant 0 : i32
    %c0_i32_0 = arith.constant 0 : i32
    %c0_i32_1 = arith.constant 0 : i32
    return %c0_i32, %c0_i32_0 : i32, i32
  }
  func.func @transform_8(%arg0: i32) -> (i32, i32) {
    %c0_i32 = arith.constant 0 : i32
    %c0_i32_0 = arith.constant 0 : i32
    %c0_i32_1 = arith.constant 0 : i32
    return %c0_i32, %c0_i32_0 : i32, i32
  }
  func.func @transform_9(%arg0: i32) -> (i32, i32) {
    %c0_i32 = arith.constant 0 : i32
    %c0_i32_0 = arith.constant 0 : i32
    return %arg0, %c0_i32 : i32, i32
  }
}

</mosaic_0001>

<bundles_post_ra>
// kernel: tpu_custom_call.1
= control target key start
LH: loop header
LB: loop body
LE: loop exit
PB: predicated region body
PF: predicated region fallthrough
CT: control target
= control target key end

     0   :  { %14 = vsyncpa [#allocation3], 0  ;;  %s1540_s0 = inlined_call_operand.hbm [shape: f32[8,32], index: 0, kind: input, shape index: {}]   ;;  %s1541_s1 = inlined_call_operand.hbm [shape: bf16[32,128], index: 1, kind: input, shape index: {}]   ;;  %s1542_s2 = inlined_call_operand.vmem [shape: f32[1,128], index: 2, kind: input, shape index: {}]   ;;  %s1543_s3 = inlined_call_operand.hbm [shape: bf16[128,128], index: 3, kind: input, shape index: {}]   ;;  %s1544_s4 = inlined_call_operand.vmem [shape: f32[1,128], index: 4, kind: input, shape index: {}]   ;;  %s1545_s5 = inlined_call_operand.hbm [shape: bf16[128,512], index: 5, kind: input, shape index: {}]   ;;  %s1546_s6 = inlined_call_operand.vmem [shape: f32[1,512], index: 6, kind: input, shape index: {}]   ;;  %s1547_s7 = inlined_call_operand.hbm [shape: bf16[512,128], index: 7, kind: input, shape index: {}]   ;;  %s1548_s8 = inlined_call_operand.vmem [shape: f32[1,128], index: 8, kind: input, shape index: {}]   ;;  %s1549_s9 = inlined_call_operand.hbm [shape: f32[8,128], index: 9, kind: output, shape index: {}]  }
   0x1   :  { %15 = vsyncpa [#allocation6], 0 }
   0x2   :  { %16 = vsyncpa [#allocation9], 0 }
   0x3   :  { %17 = vsyncpa [#allocation4], 0  ;;  %s1427_s30 = smov [#allocation5]  }
   0x4   :  { %s33_s10 = sshll.u32 %s1427_s30, 4  ;;  %s34_s10 = int_to_ptr.vmem [resolvable:$true] %s33_s10 }
   0x5   :  { %s1307_s11 = scalar_lea.vmem %s34_s10, 256  ;;  %p1312_p1 = scmp.lt.s32.totalorder %s34_s10, %s34_s10 }
   0x6   :  { %p1308_p0 = scmp.ne.s32.totalorder %s34_s10, %s1307_s11  ;;  %p1313_p2 = scmp.lt.s32.totalorder %s1307_s11, %s1307_s11 }
   0x8   :  { %p1314_p3 = por %p1313_p2, %p1312_p1 }
   0xa   :  { %p1315_p4 = pnand %p1314_p3, %p1308_p0 }
   0xc   :  { %1318 = shalt.err (!%p1315_p4)
}
   0xd   :  { %s1428_s12 = smov 64   ;;  %s1429_s13 = smov 4  }
   0xe   :  { %39 = dma.hbm_to_vmem [thread:$0]  %s1541_s1, 256, %s34_s10, [#allocation6], %s1428_s12, %s1428_s12, %s1429_s13  }
   0xf   :  { %s1430_s16 = smov [#allocation8]  }
  0x10   :  { %s61_s17 = sshll.u32 %s1430_s16, 4  ;;  %s62_s17 = int_to_ptr.vmem [resolvable:$true] %s61_s17 }
  0x11   :  { %s1327_s18 = scalar_lea.vmem %s62_s17, 4096  ;;  %p1332_p6 = scmp.lt.s32.totalorder %s62_s17, %s62_s17 }
  0x12   :  { %p1328_p5 = scmp.ne.s32.totalorder %s62_s17, %s1327_s18  ;;  %p1333_p7 = scmp.lt.s32.totalorder %s1327_s18, %s1327_s18 }
  0x14   :  { %p1334_p8 = por %p1333_p7, %p1332_p6 }
  0x16   :  { %p1335_p9 = pnand %p1334_p8, %p1328_p5 }
  0x18   :  { %1338 = shalt.err (!%p1335_p9)
}
  0x19   :  { %s1431_s19 = smov 256   ;;  %s1432_s20 = smov 16  }
  0x1a   :  { %67 = dma.hbm_to_vmem [thread:$0]  %s1545_s5, 4096, %s62_s17, [#allocation9], %s1431_s19, %s1431_s19, %s1432_s20  }
  0x1b   :  { %s1433_s23 = smov [#allocation2]   ;;  %s1434_s25 = smov [#allocation7]  }
  0x1c   :  { %s24_s24 = sshll.u32 %s1433_s23, 4  ;;  %s47_s1 = sshll.u32 %s1434_s25, 4  ;;  %s25_s24 = int_to_ptr.vmem [resolvable:$true] %s24_s24  ;;  %s48_s1 = int_to_ptr.vmem [resolvable:$true] %s47_s1 }
  0x1d   :  { %s1347_s26 = scalar_lea.vmem %s25_s24, 128  ;;  %p1352_p11 = scmp.lt.s32.totalorder %s25_s24, %s25_s24 }
  0x1e   :  { %p1348_p10 = scmp.ne.s32.totalorder %s25_s24, %s1347_s26  ;;  %p1353_p12 = scmp.lt.s32.totalorder %s1347_s26, %s1347_s26 }
  0x20   :  { %p1354_p13 = por %p1353_p12, %p1352_p11 }
  0x22   :  { %p1355_p0 = pnand %p1354_p13, %p1348_p10 }
  0x24   :  { %1358 = shalt.err (!%p1355_p0)
}
  0x25   :  { %27 = dma.hbm_to_vmem [thread:$0]  %s1540_s0, 128, %s25_s24, [#allocation3]  }
  0x26   :  { %s1367_s29 = scalar_lea.vmem %s48_s1, 1024  ;;  %p1372_p2 = scmp.lt.s32.totalorder %s48_s1, %s48_s1 }
  0x27   :  { %p1368_p1 = scmp.ne.s32.totalorder %s48_s1, %s1367_s29  ;;  %p1373_p3 = scmp.lt.s32.totalorder %s1367_s29, %s1367_s29 }
  0x29   :  { %p1374_p4 = por %p1373_p3, %p1372_p2 }
  0x2b   :  { %p1375_p5 = pnand %p1374_p4, %p1368_p1 }
  0x2d   :  { %1378 = shalt.err (!%p1375_p5)
}
  0x2e   :  { %53 = dma.hbm_to_vmem [thread:$0]  %s1543_s3, 1024, %s48_s1, [#allocation6], %s1428_s12, %s1428_s12, %s1429_s13  }
  0x2f   :  { %s1435_s10 = smov [#allocation10]  }
  0x30   :  { %s75_s11 = sshll.u32 %s1435_s10, 4  ;;  %s76_s11 = int_to_ptr.vmem [resolvable:$true] %s75_s11 }
  0x31   :  { %s1387_s14 = scalar_lea.vmem %s76_s11, 4096  ;;  %p1392_p7 = scmp.lt.s32.totalorder %s76_s11, %s76_s11 }
  0x32   :  { %p1388_p6 = scmp.ne.s32.totalorder %s76_s11, %s1387_s14  ;;  %p1393_p8 = scmp.lt.s32.totalorder %s1387_s14, %s1387_s14 }
  0x34   :  { %p1394_p9 = por %p1393_p8, %p1392_p7 }
  0x36   :  { %p1395_p10 = pnand %p1394_p9, %p1388_p6 }
  0x38   :  { %1398 = shalt.err (!%p1395_p10)
}
  0x39   :  { %81 = dma.hbm_to_vmem [thread:$0]  %s1547_s7, 4096, %s76_s11, [#allocation9], %s1428_s12, %s1428_s12, %s1429_s13  }
  0x3a   :  { %1419 = dma.done.wait [#allocation3], 128  }
  0x3b   :  { %1420 = vsyncadd [#allocation3], 4294967168 }
  0x3c   :  { %1421 = dma.done.wait [#allocation6], 1280  }
  0x3d   :  { %1422 = vsyncadd [#allocation6], 4294966016 }
  0x3e   :  { %1423 = dma.done.wait [#allocation9], 8192  }
  0x3f   :  { %1424 = vsyncadd [#allocation9], 4294959104  ;;  %v1436_v0 = vmov 0.0   ;;  %vm1437_vm0 = vmmov 0   ;;  %v1193_v1 = vld [vmem:[#allocation5 + $0x8] sm:$0xff]   ;;  %v1194_v2 = vld [vmem:[#allocation5] sm:$0xff]  }
  0x40   :  { %1149 = vmatprep.subr.bf16.mxu0 %v1436_v0  ;;  %1153 = vmatprep.mubr.msk.bf16.mxu0 %vm1437_vm0, %v1436_v0  ;;  %v100_v3 = vld [vmem:[#allocation2] sm:$0xff]  ;;  %v1195_v4 = vld [vmem:[#allocation7 + $0x38] sm:$0xff]   ;;  %v1196_v6 = vld [vmem:[#allocation7 + $0x30] sm:$0xff]   ;;  %vm125_vm1 = vcmask 261120   ;;  %v1438_v53 = vmov 0   ;;  %vm975_vm2 = vcmask 261312  }
  0x41   :  { %1157 = vmatprep.subr.bf16.mxu1 %v1436_v0  ;;  %1173 = vmatprep.mubr.msk.bf16.mxu1 %vm1437_vm0, %v1436_v0  ;;  %v101_v5 = vpack.c.bf16 %v100_v3, %v100_v3  ;;  %v1197_v7 = vld [vmem:[#allocation7 + $0x28] sm:$0xff]   ;;  %v1198_v8 = vld [vmem:[#allocation7 + $0x20] sm:$0xff]   ;;  %v1199_v9 = vld [vmem:[#allocation7 + $0x18] sm:$0xff]   ;;  %vm943_vm3 = vcmask 130112   ;;  %vm959_vm4 = vcmask 195712   ;;  %vm931_vm5 = vcmask 64512  }
  0x42   :  { %1150 = vmatpush3.bf16.msra.mxu0 %v1193_v1  ;;  %1158 = vmatpush3.bf16.msra.mxu1 %v1195_v4  ;;  %v1200_v10 = vld [vmem:[#allocation7 + $0x10] sm:$0xff]   ;;  %v1201_v11 = vld [vmem:[#allocation7 + $0x8] sm:$0xff]   ;;  %v1202_v12 = vld [vmem:[#allocation7] sm:$0xff]   ;;  %s1440_s17 = smov 112   ;;  %s1441_s18 = smov 104   ;;  %vm992_vm6 = vcmask 130048  }
  0x43   :  { %1151 = vmatprep.subr.bf16.mxu0 %v1436_v0  ;;  %1159 = vmatprep.subr.bf16.mxu1 %v1436_v0  ;;  %v1203_v13 = vld [vmem:[#allocation8 + $0xe0] ss:$16 sps:$4 sm:$0xff]   ;;  %v1205_v14 = vld [vmem:[#allocation8 + $0xe4] ss:$16 sps:$4 sm:$0xff]   ;;  %v1208_v15 = vld [vmem:[#allocation8 + $0xec] ss:$16 sps:$4 sm:$0xff]  }
  0x44   :  { %v1211_v16 = vld [vmem:[#allocation8 + $0xc4] ss:$16 sps:$4 sm:$0xff]   ;;  %v1209_v17 = vld [vmem:[#allocation8 + $0xc0] ss:$16 sps:$4 sm:$0xff]   ;;  %v1015_v28 = vld [vmem:[%s1542_s2] ss:$0 sm:$0xff] }
  0x45   :  { %v1217_v18 = vld [vmem:[#allocation8 + $0xa4] ss:$16 sps:$4 sm:$0xff]   ;;  %v1215_v19 = vld [vmem:[#allocation8 + $0xa0] ss:$16 sps:$4 sm:$0xff]   ;;  %v1206_v34 = vld [vmem:[#allocation8 + $0xe8] ss:$16 sps:$4 sm:$0xff]  }
  0x46   :  { %1152 = vmatpush3.bf16.msra.mxu0 %v1194_v2  ;;  %1160 = vmatpush3.bf16.msra.mxu1 %v1196_v6  ;;  %v1223_v20 = vld [vmem:[#allocation8 + $0x84] ss:$16 sps:$4 sm:$0xff]   ;;  %v1221_v21 = vld [vmem:[#allocation8 + $0x80] ss:$16 sps:$4 sm:$0xff]   ;;  %v1214_v36 = vld [vmem:[#allocation8 + $0xcc] ss:$16 sps:$4 sm:$0xff]  }
  0x47   :  { %1161 = vmatprep.subr.bf16.mxu1 %v1436_v0  ;;  %498 = vmatprep.subr.bf16.mxu0 %v1205_v14  ;;  %v1229_v22 = vld [vmem:[#allocation8 + $0x64] ss:$16 sps:$4 sm:$0xff]   ;;  %v1227_v23 = vld [vmem:[#allocation8 + $0x60] ss:$16 sps:$4 sm:$0xff]   ;;  %v1212_v38 = vld [vmem:[#allocation8 + $0xc8] ss:$16 sps:$4 sm:$0xff]  }
  0x48   :  { %v1235_v24 = vld [vmem:[#allocation8 + $0x44] ss:$16 sps:$4 sm:$0xff]   ;;  %v1233_v25 = vld [vmem:[#allocation8 + $0x40] ss:$16 sps:$4 sm:$0xff]   ;;  %v1220_v39 = vld [vmem:[#allocation8 + $0xac] ss:$16 sps:$4 sm:$0xff]  }
  0x49   :  { %1154 = vmatmul.mubr.msk.bf16.vlgmr.msra.gmra.mxu0 %vm125_vm1, %v101_v5  ;;  %v1241_v26 = vld [vmem:[#allocation8 + $0x24] ss:$16 sps:$4 sm:$0xff]   ;;  %v1239_v27 = vld [vmem:[#allocation8 + $0x20] ss:$16 sps:$4 sm:$0xff]   ;;  %v1218_v40 = vld [vmem:[#allocation8 + $0xa8] ss:$16 sps:$4 sm:$0xff]  }
  0x4a   :  { %1162 = vmatpush3.bf16.msra.mxu1 %v1197_v7  ;;  %499 = vmatpush1.bf16.msra.mxu0 %v1203_v13  ;;  %v1226_v41 = vld [vmem:[#allocation8 + $0x8c] ss:$16 sps:$4 sm:$0xff]   ;;  %v1224_v42 = vld [vmem:[#allocation8 + $0x88] ss:$16 sps:$4 sm:$0xff]   ;;  %v1247_v49 = vld [vmem:[#allocation8 + $0x4] ss:$16 sps:$4 sm:$0xff]  }
  0x4b   :  { %1163 = vmatprep.subr.bf16.mxu1 %v1436_v0  ;;  %500 = vmatprep.subr.bf16.mxu0 %v1211_v16  ;;  %v1232_v43 = vld [vmem:[#allocation8 + $0x6c] ss:$16 sps:$4 sm:$0xff]   ;;  %v1230_v44 = vld [vmem:[#allocation8 + $0x68] ss:$16 sps:$4 sm:$0xff]   ;;  %v1245_v51 = vld [vmem:[#allocation8] ss:$16 sps:$4 sm:$0xff]  }
  0x4c   :  { %v1238_v45 = vld [vmem:[#allocation8 + $0x4c] ss:$16 sps:$4 sm:$0xff]   ;;  %v1236_v46 = vld [vmem:[#allocation8 + $0x48] ss:$16 sps:$4 sm:$0xff]   ;;  %530 = vmatprep.mubr.bf16.mxu0 %v1438_v53  ;;  %v1255_v1 = vld [vmem:[#allocation10 + $0x70] sm:$0xff]   ;;  %vm994_vm7 = vcmask 195584  }
  0x4d   :  { %v1244_v47 = vld [vmem:[#allocation8 + $0x2c] ss:$16 sps:$4 sm:$0xff]   ;;  %v1242_v48 = vld [vmem:[#allocation8 + $0x28] ss:$16 sps:$4 sm:$0xff]   ;;  %v1256_v2 = vld [vmem:[#allocation10 + $0xf0] sm:$0xff]   ;;  %s1442_s19 = smov [#allocation11]  }
  0x4e   :  { %1164 = vmatpush3.bf16.msra.mxu1 %v1198_v8  ;;  %501 = vmatpush1.bf16.msra.mxu0 %v1209_v17  ;;  %v1250_v50 = vld [vmem:[#allocation8 + $0xc] ss:$16 sps:$4 sm:$0xff]   ;;  %v1248_v52 = vld [vmem:[#allocation8 + $0x8] ss:$16 sps:$4 sm:$0xff]   ;;  %v1257_v4 = vld [vmem:[#allocation10 + $0x30] sm:$0xff]   ;;  %s1004_s20 = sshll.u32 %s1442_s19, 4  ;;  %s1005_s20 = int_to_ptr.vmem [resolvable:$true] %s1004_s20 }
  0x4f   :  { %1165 = vmatprep.subr.bf16.mxu1 %v1436_v0  ;;  %502 = vmatprep.subr.bf16.mxu0 %v1217_v18  ;;  %v1251_v54 = vld [vmem:[#allocation10 + $0x78] sm:$0xff]   ;;  %v1019_v56 = vld [vmem:[%s1544_s4] ss:$0 sm:$0xff]  ;;  %v1258_v5 = vld [vmem:[#allocation10 + $0xb0] sm:$0xff]   ;;  %s1399_s21 = scalar_lea.vmem %s1005_s20, 128  ;;  %p1404_p12 = scmp.lt.s32.totalorder %s1005_s20, %s1005_s20 }
  0x50   :  { %v1252_v55 = vld [vmem:[#allocation10 + $0xf8] sm:$0xff]   ;;  %v1259_v6 = vld [vmem:[#allocation10 + $0x68] sm:$0xff]   ;;  %v1266_v13 = vld [vmem:[#allocation10 + $0xa0] sm:$0xff]   ;;  %p1400_p11 = scmp.ne.s32.totalorder %s1005_s20, %s1399_s21  ;;  %p1405_p13 = scmp.lt.s32.totalorder %s1399_s21, %s1399_s21 }
  0x51   :  { %v1253_v62 = vld [vmem:[#allocation10 + $0x38] sm:$0xff]   ;;  %v1260_v7 = vld [vmem:[#allocation10 + $0xe8] sm:$0xff]   ;;  %v1271_v18 = vld [vmem:[#allocation10 + $0x50] sm:$0xff]  }
  0x52   :  { %1166 = vmatpush3.bf16.msra.mxu1 %v1199_v9  ;;  %503 = vmatpush1.bf16.msra.mxu0 %v1215_v19  ;;  %v1254_v63 = vld [vmem:[#allocation10 + $0xb8] sm:$0xff]   ;;  %v1261_v8 = vld [vmem:[#allocation10 + $0x28] sm:$0xff]   ;;  %v1272_v19 = vld [vmem:[#allocation10 + $0xd0] sm:$0xff]   ;;  %p1406_p0 = por %p1405_p13, %p1404_p12 }
  0x53   :  { %1167 = vmatprep.subr.bf16.mxu1 %v1436_v0  ;;  %504 = vmatprep.subr.bf16.mxu0 %v1223_v20  ;;  %v1262_v9 = vld [vmem:[#allocation10 + $0xa8] sm:$0xff]   ;;  %v1267_v14 = vld [vmem:[#allocation10 + $0x58] sm:$0xff]   ;;  %v1273_v20 = vld [vmem:[#allocation10 + $0x10] sm:$0xff]  }
  0x54   :  { %v1269_v16 = vld [vmem:[#allocation10 + $0x18] sm:$0xff]   ;;  %p1407_p1 = pnand %p1406_p0, %p1400_p11 }
  0x55   :  { %v1270_v17 = vld [vmem:[#allocation10 + $0x98] sm:$0xff]  }
  0x56   :  { %1168 = vmatpush3.bf16.msra.mxu1 %v1200_v10  ;;  %505 = vmatpush1.bf16.msra.mxu0 %v1221_v21  ;;  %v1263_v10 = vld [vmem:[#allocation10 + $0x60] sm:$0xff]   ;;  %v1274_v21 = vld [vmem:[#allocation10 + $0x90] sm:$0xff]  }
  0x57   :  { %1169 = vmatprep.subr.bf16.mxu1 %v1436_v0  ;;  %506 = vmatprep.subr.bf16.mxu0 %v1229_v22  ;;  %v1275_v22 = vld [vmem:[#allocation10 + $0x48] sm:$0xff]  }
  0x5a   :  { %1170 = vmatpush3.bf16.msra.mxu1 %v1201_v11  ;;  %507 = vmatpush1.bf16.msra.mxu0 %v1227_v23  ;;  %v1264_v11 = vld [vmem:[#allocation10 + $0xe0] sm:$0xff]   ;;  %v1276_v23 = vld [vmem:[#allocation10 + $0xc8] sm:$0xff]  }
  0x5b   :  { %1171 = vmatprep.subr.bf16.mxu1 %v1436_v0  ;;  %508 = vmatprep.subr.bf16.mxu0 %v1235_v24  ;;  %v1277_v24 = vld [vmem:[#allocation10 + $0x8] sm:$0xff]  }
  0x5e   :  { %1172 = vmatpush3.bf16.msra.mxu1 %v1202_v12  ;;  %509 = vmatpush1.bf16.msra.mxu0 %v1233_v25  ;;  %v1265_v12 = vld [vmem:[#allocation10 + $0x20] sm:$0xff]   ;;  %v1278_v25 = vld [vmem:[#allocation10 + $0x88] sm:$0xff]  }
  0x5f   :  { %539 = vmatprep.subr.bf16.mxu1 %v1208_v15  ;;  %510 = vmatprep.subr.bf16.mxu0 %v1241_v26  ;;  %v1268_v15 = vld [vmem:[#allocation10 + $0xd8] sm:$0xff]   ;;  %v1279_v26 = vld [vmem:[#allocation10 + $0x40] sm:$0xff]  }
  0x62   :  { %511 = vmatpush1.bf16.msra.mxu0 %v1239_v27  ;;  %v1280_v27 = vld [vmem:[#allocation10 + $0xc0] sm:$0xff]  }
  0x63   :  { %512 = vmatprep.subr.bf16.mxu0 %v1247_v49 }
  0x66   :  { %513 = vmatpush1.bf16.msra.mxu0 %v1245_v51 }
  0x67   :  { %1105 = vmatprep.subr.bf16.mxu0 %v1251_v54 }
 0x109   :  { %v163_v29 = vpop.f32.mrf.mxu0 }
 0x10a   :  { %v164_v30 = vadd.f32 %v1015_v28, %v163_v29  ;;  %v1281_v28 = vld [vmem:[#allocation10] sm:$0xff]  }
 0x10b   :  { %v1155_v31 = vpop.f32.mrf.mxu0  ;;  %v1282_v29 = vld [vmem:[#allocation10 + $0x80] sm:$0xff]  }
 0x10c   :  { %v169_v32 = vmax.f32 %v164_v30, 0.0  ;;  %v318_v30 = vlaneseq }
 0x10d   :  { %v166_v33 = vpop.f32.mrf.mxu0 }
 0x10e   :  { %v170_v35 = vpack.c.bf16 %v169_v32, %v169_v32  ;;  %v319_v31 = vshrl.u32 %v318_v30, 7 }
 0x10f   :  { %v1156_v37 = vpop.f32.mrf.mxu0 }
 0x110   :  { %1174 = vmatmul.mubr.bf16.vlgmr.msra.gmra.mxu1 %v170_v35  ;;  %v320_v32 = vsub.s32 0, %v319_v31  ;;  %v328_v33 = vsub.s32 2, %v319_v31  ;;  %v324_v35 = vsub.s32 1, %v319_v31 }
 0x111   :  { %540 = vmatpush1.bf16.msra.mxu1 %v1206_v34  ;;  %571 = vmatprep.mubr.bf16.mxu1 %v1438_v53  ;;  %v316_v34 = vld [vmem:[%s1546_s6] sm:$0xf] }
 0x112   :  { %541 = vmatprep.subr.bf16.mxu1 %v1214_v36  ;;  %v332_v36 = vsub.s32 3, %v319_v31  ;;  %v321_v37 = vrot.slane %v316_v34, %v320_v32 }
 0x115   :  { %542 = vmatpush1.bf16.msra.mxu1 %v1212_v38  ;;  %v329_v38 = vrot.slane %v316_v34, %v328_v33 }
 0x116   :  { %543 = vmatprep.subr.bf16.mxu1 %v1220_v39  ;;  %v325_v39 = vrot.slane %v316_v34, %v324_v35 }
 0x119   :  { %544 = vmatpush1.bf16.msra.mxu1 %v1218_v40  ;;  %v333_v40 = vrot.slane %v316_v34, %v332_v36 }
 0x11a   :  { %545 = vmatprep.subr.bf16.mxu1 %v1226_v41 }
 0x11d   :  { %546 = vmatpush1.bf16.msra.mxu1 %v1224_v42 }
 0x11e   :  { %547 = vmatprep.subr.bf16.mxu1 %v1232_v43 }
 0x121   :  { %548 = vmatpush1.bf16.msra.mxu1 %v1230_v44 }
 0x122   :  { %549 = vmatprep.subr.bf16.mxu1 %v1238_v45 }
 0x125   :  { %550 = vmatpush1.bf16.msra.mxu1 %v1236_v46 }
 0x126   :  { %551 = vmatprep.subr.bf16.mxu1 %v1244_v47 }
 0x129   :  { %552 = vmatpush1.bf16.msra.mxu1 %v1242_v48 }
 0x12a   :  { %553 = vmatprep.subr.bf16.mxu1 %v1250_v50 }
 0x12d   :  { %554 = vmatpush1.bf16.msra.mxu1 %v1248_v52 }
 0x12e   :  { %1127 = vmatprep.subr.bf16.mxu1 %v1252_v55 }
 0x1d0   :  { %v276_v57 = vpop.f32.mrf.mxu1 }
 0x1d1   :  { %v277_v58 = vadd.f32 %v1019_v56, %v276_v57 }
 0x1d2   :  { %v1175_v59 = vpop.f32.mrf.mxu1 }
 0x1d3   :  { %v282_v60 = vmax.f32 %v277_v58, 0.0 }
 0x1d4   :  { %v279_v61 = vpop.f32.mrf.mxu1 }
 0x1d5   :  { %v283_v0 = vpack.c.bf16 %v282_v60, %v282_v60 }
 0x1d6   :  { %v1176_v3 = vpop.f32.mrf.mxu1 }
 0x1d7   :  { %531 = vmatmul.mubr.bf16.vlgmr.msra.gmra.mxu0 %v283_v0  ;;  %572 = vmatmul.mubr.bf16.vlgmr.msra.gmra.mxu1 %v283_v0 }
 0x1d8   :  { %1106 = vmatpush3.bf16.msra.mxu0 %v1253_v62  ;;  %1128 = vmatpush3.bf16.msra.mxu1 %v1254_v63  ;;  %v1060_v63 = vld [vmem:[%s1548_s8] ss:$0 sm:$0xff]  ;;  %s1439_s8 = smov 120  }
 0x1d9   :  { %1107 = vmatprep.subr.bf16.mxu0 %v1255_v1  ;;  %1129 = vmatprep.subr.bf16.mxu1 %v1256_v2 }
 0x1dc   :  { %1108 = vmatpush3.bf16.msra.mxu0 %v1257_v4  ;;  %1130 = vmatpush3.bf16.msra.mxu1 %v1258_v5 }
 0x1dd   :  { %1109 = vmatprep.subr.bf16.mxu0 %v1259_v6  ;;  %1131 = vmatprep.subr.bf16.mxu1 %v1260_v7 }
 0x1e0   :  { %1110 = vmatpush3.bf16.msra.mxu0 %v1261_v8  ;;  %1132 = vmatpush3.bf16.msra.mxu1 %v1262_v9 }
 0x1e1   :  { %1111 = vmatprep.subr.bf16.mxu0 %v1263_v10  ;;  %1133 = vmatprep.subr.bf16.mxu1 %v1264_v11 }
 0x1e4   :  { %1112 = vmatpush3.bf16.msra.mxu0 %v1265_v12  ;;  %1134 = vmatpush3.bf16.msra.mxu1 %v1266_v13 }
 0x1e5   :  { %1113 = vmatprep.subr.bf16.mxu0 %v1267_v14  ;;  %1135 = vmatprep.subr.bf16.mxu1 %v1268_v15 }
 0x1e8   :  { %1114 = vmatpush3.bf16.msra.mxu0 %v1269_v16  ;;  %1136 = vmatpush3.bf16.msra.mxu1 %v1270_v17 }
 0x1e9   :  { %1115 = vmatprep.subr.bf16.mxu0 %v1271_v18  ;;  %1137 = vmatprep.subr.bf16.mxu1 %v1272_v19 }
 0x1ec   :  { %1116 = vmatpush3.bf16.msra.mxu0 %v1273_v20  ;;  %1138 = vmatpush3.bf16.msra.mxu1 %v1274_v21 }
 0x1ed   :  { %1117 = vmatprep.subr.bf16.mxu0 %v1275_v22  ;;  %1139 = vmatprep.subr.bf16.mxu1 %v1276_v23 }
 0x1f0   :  { %1118 = vmatpush3.bf16.msra.mxu0 %v1277_v24  ;;  %1140 = vmatpush3.bf16.msra.mxu1 %v1278_v25 }
 0x1f1   :  { %1119 = vmatprep.subr.bf16.mxu0 %v1279_v26  ;;  %1141 = vmatprep.subr.bf16.mxu1 %v1280_v27 }
 0x1f4   :  { %1120 = vmatpush3.bf16.msra.mxu0 %v1281_v28  ;;  %1142 = vmatpush3.bf16.msra.mxu1 %v1282_v29 }
 0x297   :  { %v532_v41 = vpop.f32.mrf.mxu0  ;;  %v573_v42 = vpop.f32.mrf.mxu1 }
 0x298   :  { %v533_v43 = vadd.f32 %v532_v41, %v321_v37  ;;  %v574_v44 = vadd.f32 %v573_v42, %v329_v38 }
 0x299   :  { %v534_v45 = vpop.f32.mrf.mxu0  ;;  %v575_v46 = vpop.f32.mrf.mxu1 }
 0x29a   :  { %v535_v47 = vadd.f32 %v534_v45, %v325_v39  ;;  %v576_v48 = vadd.f32 %v575_v46, %v333_v40  ;;  %v580_v49 = vmax.f32 %v533_v43, 0.0  ;;  %v582_v50 = vmax.f32 %v574_v44, 0.0 }
 0x29b   :  { %v536_v51 = vpop.f32.mrf.mxu0  ;;  %v577_v52 = vpop.f32.mrf.mxu1 }
 0x29c   :  { %v581_v53 = vmax.f32 %v535_v47, 0.0  ;;  %v583_v54 = vmax.f32 %v576_v48, 0.0  ;;  %v584_v59 = vpack.c.bf16 %v580_v49, %v580_v49  ;;  %v586_v60 = vpack.c.bf16 %v582_v50, %v582_v50 }
 0x29d   :  { %v537_v55 = vpop.f32.mrf.mxu0  ;;  %v578_v56 = vpop.f32.mrf.mxu1 }
 0x29e   :  { %v585_v57 = vpack.c.bf16 %v581_v53, %v581_v53  ;;  %v587_v58 = vpack.c.bf16 %v583_v54, %v583_v54 }
 0x2a0   :  { %883 = vmatprep.mubr.bf16.mxu0 %v585_v57  ;;  %923 = vmatprep.mubr.bf16.mxu1 %v587_v58 }
 0x2a1   :  { %884 = vmatmul.mubr.bf16.vlgmr.msra.gmra.mxu0 %v584_v59  ;;  %924 = vmatmul.mubr.bf16.vlgmr.msra.gmra.mxu1 %v586_v60 }
 0x361   :  { %v1121_v61 = vpop.f32.mrf.mxu0  ;;  %v1143_v62 = vpop.f32.mrf.mxu1 }
 0x363   :  { %v1122_v0 = vpop.f32.mrf.mxu0  ;;  %v1144_v1 = vpop.f32.mrf.mxu1 }
 0x364   :  { %v1123_v2 = vadd.f32 %v1122_v0, %v1121_v61  ;;  %v1145_v6 = vadd.f32 %v1144_v1, %v1143_v62 }
 0x365   :  { %v1124_v3 = vpop.f32.mrf.mxu0  ;;  %v1146_v4 = vpop.f32.mrf.mxu1 }
 0x366   :  { %v886_v5 = vadd.f32 %v1123_v2, %v1060_v63 }
 0x367   :  { %v1125_v7 = vpop.f32.mrf.mxu0  ;;  %v1147_v8 = vpop.f32.mrf.mxu1 }
 0x368   :  { %v926_v9 = vadd.f32 %v1145_v6, %v886_v5 }
 0x36a   :  { %v976_v10 = vsel %vm975_vm2, %v926_v9, -inf  ;;  %v944_v11 = vsel %vm943_vm3, %v926_v9, -inf  ;;  %v960_v12 = vsel %vm959_vm4, %v926_v9, -inf  ;;  %v932_v13 = vsel %vm931_vm5, %v926_v9, -inf }
 0x36b   :  { %977 = vmax.xlane.f32.xlu1 %v976_v10  ;;  %945 = vmax.xlane.f32.xlu0 %v944_v11 }
 0x36f   :  { %961 = vmax.xlane.f32.xlu0 %v960_v12  ;;  %933 = vmax.xlane.f32.xlu1 %v932_v13 }
 0x3f4   :  { %v946_v14 = vpop.xlane.xlu0 %945  ;;  %v978_v16 = vpop.xlane.xlu1 %977 }
 0x3f5   :  { %v947_v15 = vsub.f32 %v926_v9, %v946_v14  ;;  %v979_v19 = vsub.f32 %v926_v9, %v978_v16 }
 0x3f7   :  { %v948_v17 = vmul.f32 1.442695, %v947_v15  ;;  %v980_v22 = vmul.f32 1.442695, %v979_v19 }
 0x3f8   :  { %v962_v18 = vpop.xlane.xlu0 %961  ;;  %v934_v26 = vpop.xlane.xlu1 %933 }
 0x3f9   :  { %v963_v20 = vsub.f32 %v926_v9, %v962_v18  ;;  %1283 = vpow2.f32 %v948_v17  ;;  %v935_v27 = vsub.f32 %v926_v9, %v934_v26 }
 0x3fb   :  { %v964_v21 = vmul.f32 1.442695, %v963_v20  ;;  %v936_v28 = vmul.f32 1.442695, %v935_v27 }
 0x3fd   :  { %1285 = vpow2.f32 %v964_v21 }
 0x3fe   :  { %1287 = vpow2.f32 %v980_v22 }
 0x3ff   :  { %1289 = vpow2.f32 %v936_v28 }
 0x406   :  { %v1284_v23 = vpop.eup %1283 }
 0x407   :  { %951 = vrot.lane.b32.xlu0 %v1284_v23, %s1439_s8 }
 0x40a   :  { %v1286_v24 = vpop.eup %1285 }
 0x40b   :  { %967 = vrot.lane.b32.xlu1 %v1286_v24, %s1440_s17  ;;  %v1288_v25 = vpop.eup %1287 }
 0x40c   :  { %v1290_v29 = vpop.eup %1289 }
 0x40d   :  { %v938_v30 = vsel %vm931_vm5, %v1290_v29, 0.0 }
 0x40f   :  { %983 = vrot.lane.b32.xlu1 %v1288_v25, %s1441_s18 }
 0x433   :  { %939 = vadd.xlane.f32.xlu1 %v938_v30 }
 0x479   :  { %v952_v31 = vpop.permute.xlu0 %951 }
 0x47a   :  { %v954_v32 = vsel %vm931_vm5, %v952_v31, 0.0 }
 0x47b   :  { %955 = vadd.xlane.f32.xlu0 %v954_v32 }
 0x47d   :  { %v968_v33 = vpop.permute.xlu1 %967 }
 0x47e   :  { %v970_v34 = vsel %vm931_vm5, %v968_v33, 0.0 }
 0x47f   :  { %971 = vadd.xlane.f32.xlu0 %v970_v34 }
 0x481   :  { %v984_v35 = vpop.permute.xlu1 %983 }
 0x482   :  { %v986_v36 = vsel %vm931_vm5, %v984_v35, 0.0 }
 0x483   :  { %987 = vadd.xlane.f32.xlu0 %v986_v36 }
 0x4bc   :  { %v940_v38 = vpop.xlane.xlu1 %939 }
 0x504   :  { %v956_v37 = vpop.xlane.xlu0 %955 }
 0x505   :  { %1291 = vrcp.f32 %v956_v37 }
 0x506   :  { %1293 = vrcp.f32 %v940_v38 }
 0x508   :  { %v972_v39 = vpop.xlane.xlu0 %971 }
 0x509   :  { %1295 = vrcp.f32 %v972_v39 }
 0x50c   :  { %v988_v40 = vpop.xlane.xlu0 %987 }
 0x50d   :  { %1297 = vrcp.f32 %v988_v40 }
 0x512   :  { %v1292_v41 = vpop.eup %1291 }
 0x513   :  { %v1294_v42 = vpop.eup %1293  ;;  %v958_v44 = vmul.f32 %v1292_v41, %v1284_v23 }
 0x514   :  { %v942_v46 = vmul.f32 %v1294_v42, %v1290_v29 }
 0x516   :  { %v1296_v43 = vpop.eup %1295  ;;  %v991_v49 = vsel %vm931_vm5, %v942_v46, %v958_v44 }
 0x517   :  { %v974_v45 = vmul.f32 %v1296_v43, %v1286_v24 }
 0x519   :  { %v993_v50 = vsel %vm992_vm6, %v991_v49, %v974_v45 }
 0x51a   :  { %v1298_v47 = vpop.eup %1297 }
 0x51b   :  { %v990_v48 = vmul.f32 %v1298_v47, %v1288_v25 }
 0x51d   :  { %v995_v51 = vsel %vm994_vm7, %v993_v50, %v990_v48 }
 0x51e   :  { %v996_v52 = vsel %vm125_vm1, %v995_v51, 0.0 }
 0x51f   :  { %997 = vst [vmem:[#allocation11] sm:$0xff] %v996_v52 }
 0x520   :  { %1410 = shalt.err (!%p1407_p1)
}
 0x521   :  { %1007 = dma.vmem_to_hbm [thread:$0]  %s1005_s20, 128, %s1549_s9, [#allocation4]  }
 0x522   :  { %1425 = dma.done.wait [#allocation4], 128  }
 0x523   :  { %1426 = vsyncadd [#allocation4], 4294967168 }
 0x524   :  { %1011 = vsyncpa [#allocation3], 1 }
 0x525   :  { %1012 = vsyncpa [#allocation6], 1 }
 0x526   :  { %1013 = vsyncpa [#allocation9], 1 }
 0x527   :  { %1014 = vsyncpa [#allocation4], 1 }

// kernel: tpu_custom_call.1
= control target key start
LH: loop header
LB: loop body
LE: loop exit
PB: predicated region body
PF: predicated region fallthrough
CT: control target
= control target key end

     0   :  { %14 = vsyncpa [#allocation3], 0  ;;  %s1540_s0 = inlined_call_operand.hbm [shape: f32[8,32], index: 0, kind: input, shape index: {}]   ;;  %s1541_s1 = inlined_call_operand.hbm [shape: bf16[32,128], index: 1, kind: input, shape index: {}]   ;;  %s1542_s2 = inlined_call_operand.vmem [shape: f32[1,128], index: 2, kind: input, shape index: {}]   ;;  %s1543_s3 = inlined_call_operand.hbm [shape: bf16[128,128], index: 3, kind: input, shape index: {}]   ;;  %s1544_s4 = inlined_call_operand.vmem [shape: f32[1,128], index: 4, kind: input, shape index: {}]   ;;  %s1545_s5 = inlined_call_operand.hbm [shape: bf16[128,512], index: 5, kind: input, shape index: {}]   ;;  %s1546_s6 = inlined_call_operand.vmem [shape: f32[1,512], index: 6, kind: input, shape index: {}]   ;;  %s1547_s7 = inlined_call_operand.hbm [shape: bf16[512,128], index: 7, kind: input, shape index: {}]   ;;  %s1548_s8 = inlined_call_operand.vmem [shape: f32[1,128], index: 8, kind: input, shape index: {}]   ;;  %s1549_s9 = inlined_call_operand.hbm [shape: f32[8,128], index: 9, kind: output, shape index: {}]  }
   0x1   :  { %15 = vsyncpa [#allocation6], 0 }
   0x2   :  { %16 = vsyncpa [#allocation9], 0 }
   0x3   :  { %17 = vsyncpa [#allocation4], 0  ;;  %s1427_s30 = smov [#allocation5]  }
   0x4   :  { %s33_s10 = sshll.u32 %s1427_s30, 4  ;;  %s34_s10 = int_to_ptr.vmem [resolvable:$true] %s33_s10 }
   0x5   :  { %s1307_s11 = scalar_lea.vmem %s34_s10, 256  ;;  %p1312_p1 = scmp.lt.s32.totalorder %s34_s10, %s34_s10 }
   0x6   :  { %p1308_p0 = scmp.ne.s32.totalorder %s34_s10, %s1307_s11  ;;  %p1313_p2 = scmp.lt.s32.totalorder %s1307_s11, %s1307_s11 }
   0x8   :  { %p1314_p3 = por %p1313_p2, %p1312_p1 }
   0xa   :  { %p1315_p4 = pnand %p1314_p3, %p1308_p0 }
   0xc   :  { %1318 = shalt.err (!%p1315_p4)
}
   0xd   :  { %s1428_s12 = smov 64   ;;  %s1429_s13 = smov 4  }
   0xe   :  { %39 = dma.hbm_to_vmem [thread:$0]  %s1541_s1, 256, %s34_s10, [#allocation6], %s1428_s12, %s1428_s12, %s1429_s13  }
   0xf   :  { %s1430_s16 = smov [#allocation8]  }
  0x10   :  { %s61_s17 = sshll.u32 %s1430_s16, 4  ;;  %s62_s17 = int_to_ptr.vmem [resolvable:$true] %s61_s17 }
  0x11   :  { %s1327_s18 = scalar_lea.vmem %s62_s17, 4096  ;;  %p1332_p6 = scmp.lt.s32.totalorder %s62_s17, %s62_s17 }
  0x12   :  { %p1328_p5 = scmp.ne.s32.totalorder %s62_s17, %s1327_s18  ;;  %p1333_p7 = scmp.lt.s32.totalorder %s1327_s18, %s1327_s18 }
  0x14   :  { %p1334_p8 = por %p1333_p7, %p1332_p6 }
  0x16   :  { %p1335_p9 = pnand %p1334_p8, %p1328_p5 }
  0x18   :  { %1338 = shalt.err (!%p1335_p9)
}
  0x19   :  { %s1431_s19 = smov 256   ;;  %s1432_s20 = smov 16  }
  0x1a   :  { %67 = dma.hbm_to_vmem [thread:$0]  %s1545_s5, 4096, %s62_s17, [#allocation9], %s1431_s19, %s1431_s19, %s1432_s20  }
  0x1b   :  { %s1433_s23 = smov [#allocation2]   ;;  %s1434_s25 = smov [#allocation7]  }
  0x1c   :  { %s24_s24 = sshll.u32 %s1433_s23, 4  ;;  %s47_s1 = sshll.u32 %s1434_s25, 4  ;;  %s25_s24 = int_to_ptr.vmem [resolvable:$true] %s24_s24  ;;  %s48_s1 = int_to_ptr.vmem [resolvable:$true] %s47_s1 }
  0x1d   :  { %s1347_s26 = scalar_lea.vmem %s25_s24, 128  ;;  %p1352_p11 = scmp.lt.s32.totalorder %s25_s24, %s25_s24 }
  0x1e   :  { %p1348_p10 = scmp.ne.s32.totalorder %s25_s24, %s1347_s26  ;;  %p1353_p12 = scmp.lt.s32.totalorder %s1347_s26, %s1347_s26 }
  0x20   :  { %p1354_p13 = por %p1353_p12, %p1352_p11 }
  0x22   :  { %p1355_p0 = pnand %p1354_p13, %p1348_p10 }
  0x24   :  { %1358 = shalt.err (!%p1355_p0)
}
  0x25   :  { %27 = dma.hbm_to_vmem [thread:$0]  %s1540_s0, 128, %s25_s24, [#allocation3]  }
  0x26   :  { %s1367_s29 = scalar_lea.vmem %s48_s1, 1024  ;;  %p1372_p2 = scmp.lt.s32.totalorder %s48_s1, %s48_s1 }
  0x27   :  { %p1368_p1 = scmp.ne.s32.totalorder %s48_s1, %s1367_s29  ;;  %p1373_p3 = scmp.lt.s32.totalorder %s1367_s29, %s1367_s29 }
  0x29   :  { %p1374_p4 = por %p1373_p3, %p1372_p2 }
  0x2b   :  { %p1375_p5 = pnand %p1374_p4, %p1368_p1 }
  0x2d   :  { %1378 = shalt.err (!%p1375_p5)
}
  0x2e   :  { %53 = dma.hbm_to_vmem [thread:$0]  %s1543_s3, 1024, %s48_s1, [#allocation6], %s1428_s12, %s1428_s12, %s1429_s13  }
  0x2f   :  { %s1435_s10 = smov [#allocation10]  }
  0x30   :  { %s75_s11 = sshll.u32 %s1435_s10, 4  ;;  %s76_s11 = int_to_ptr.vmem [resolvable:$true] %s75_s11 }
  0x31   :  { %s1387_s14 = scalar_lea.vmem %s76_s11, 4096  ;;  %p1392_p7 = scmp.lt.s32.totalorder %s76_s11, %s76_s11 }
  0x32   :  { %p1388_p6 = scmp.ne.s32.totalorder %s76_s11, %s1387_s14  ;;  %p1393_p8 = scmp.lt.s32.totalorder %s1387_s14, %s1387_s14 }
  0x34   :  { %p1394_p9 = por %p1393_p8, %p1392_p7 }
  0x36   :  { %p1395_p10 = pnand %p1394_p9, %p1388_p6 }
  0x38   :  { %1398 = shalt.err (!%p1395_p10)
}
  0x39   :  { %81 = dma.hbm_to_vmem [thread:$0]  %s1547_s7, 4096, %s76_s11, [#allocation9], %s1428_s12, %s1428_s12, %s1429_s13  }
  0x3a   :  { %1419 = dma.done.wait [#allocation3], 128  }
  0x3b   :  { %1420 = vsyncadd [#allocation3], 4294967168 }
  0x3c   :  { %1421 = dma.done.wait [#allocation6], 1280  }
  0x3d   :  { %1422 = vsyncadd [#allocation6], 4294966016 }
  0x3e   :  { %1423 = dma.done.wait [#allocation9], 8192  }
  0x3f   :  { %1424 = vsyncadd [#allocation9], 4294959104  ;;  %v1436_v0 = vmov 0.0   ;;  %vm1437_vm0 = vmmov 0   ;;  %v1193_v1 = vld [vmem:[#allocation5 + $0x8] sm:$0xff]   ;;  %v1194_v2 = vld [vmem:[#allocation5] sm:$0xff]  }
  0x40   :  { %1149 = vmatprep.subr.bf16.mxu0 %v1436_v0  ;;  %1153 = vmatprep.mubr.msk.bf16.mxu0 %vm1437_vm0, %v1436_v0  ;;  %v100_v3 = vld [vmem:[#allocation2] sm:$0xff]  ;;  %v1195_v4 = vld [vmem:[#allocation7 + $0x38] sm:$0xff]   ;;  %v1196_v6 = vld [vmem:[#allocation7 + $0x30] sm:$0xff]   ;;  %vm125_vm1 = vcmask 261120   ;;  %v1438_v53 = vmov 0   ;;  %vm975_vm2 = vcmask 261312  }
  0x41   :  { %1157 = vmatprep.subr.bf16.mxu1 %v1436_v0  ;;  %1173 = vmatprep.mubr.msk.bf16.mxu1 %vm1437_vm0, %v1436_v0  ;;  %v101_v5 = vpack.c.bf16 %v100_v3, %v100_v3  ;;  %v1197_v7 = vld [vmem:[#allocation7 + $0x28] sm:$0xff]   ;;  %v1198_v8 = vld [vmem:[#allocation7 + $0x20] sm:$0xff]   ;;  %v1199_v9 = vld [vmem:[#allocation7 + $0x18] sm:$0xff]   ;;  %vm943_vm3 = vcmask 130112   ;;  %vm959_vm4 = vcmask 195712   ;;  %vm931_vm5 = vcmask 64512  }
  0x42   :  { %1150 = vmatpush3.bf16.msra.mxu0 %v1193_v1  ;;  %1158 = vmatpush3.bf16.msra.mxu1 %v1195_v4  ;;  %v1200_v10 = vld [vmem:[#allocation7 + $0x10] sm:$0xff]   ;;  %v1201_v11 = vld [vmem:[#allocation7 + $0x8] sm:$0xff]   ;;  %v1202_v12 = vld [vmem:[#allocation7] sm:$0xff]   ;;  %s1440_s17 = smov 112   ;;  %s1441_s18 = smov 104   ;;  %vm992_vm6 = vcmask 130048  }
  0x43   :  { %1151 = vmatprep.subr.bf16.mxu0 %v1436_v0  ;;  %1159 = vmatprep.subr.bf16.mxu1 %v1436_v0  ;;  %v1203_v13 = vld [vmem:[#allocation8 + $0xe0] ss:$16 sps:$4 sm:$0xff]   ;;  %v1205_v14 = vld [vmem:[#allocation8 + $0xe4] ss:$16 sps:$4 sm:$0xff]   ;;  %v1208_v15 = vld [vmem:[#allocation8 + $0xec] ss:$16 sps:$4 sm:$0xff]  }
  0x44   :  { %v1211_v16 = vld [vmem:[#allocation8 + $0xc4] ss:$16 sps:$4 sm:$0xff]   ;;  %v1209_v17 = vld [vmem:[#allocation8 + $0xc0] ss:$16 sps:$4 sm:$0xff]   ;;  %v1015_v28 = vld [vmem:[%s1542_s2] ss:$0 sm:$0xff] }
  0x45   :  { %v1217_v18 = vld [vmem:[#allocation8 + $0xa4] ss:$16 sps:$4 sm:$0xff]   ;;  %v1215_v19 = vld [vmem:[#allocation8 + $0xa0] ss:$16 sps:$4 sm:$0xff]   ;;  %v1206_v34 = vld [vmem:[#allocation8 + $0xe8] ss:$16 sps:$4 sm:$0xff]  }
  0x46   :  { %1152 = vmatpush3.bf16.msra.mxu0 %v1194_v2  ;;  %1160 = vmatpush3.bf16.msra.mxu1 %v1196_v6  ;;  %v1223_v20 = vld [vmem:[#allocation8 + $0x84] ss:$16 sps:$4 sm:$0xff]   ;;  %v1221_v21 = vld [vmem:[#allocation8 + $0x80] ss:$16 sps:$4 sm:$0xff]   ;;  %v1214_v36 = vld [vmem:[#allocation8 + $0xcc] ss:$16 sps:$4 sm:$0xff]  }
  0x47   :  { %1161 = vmatprep.subr.bf16.mxu1 %v1436_v0  ;;  %498 = vmatprep.subr.bf16.mxu0 %v1205_v14  ;;  %v1229_v22 = vld [vmem:[#allocation8 + $0x64] ss:$16 sps:$4 sm:$0xff]   ;;  %v1227_v23 = vld [vmem:[#allocation8 + $0x60] ss:$16 sps:$4 sm:$0xff]   ;;  %v1212_v38 = vld [vmem:[#allocation8 + $0xc8] ss:$16 sps:$4 sm:$0xff]  }
  0x48   :  { %v1235_v24 = vld [vmem:[#allocation8 + $0x44] ss:$16 sps:$4 sm:$0xff]   ;;  %v1233_v25 = vld [vmem:[#allocation8 + $0x40] ss:$16 sps:$4 sm:$0xff]   ;;  %v1220_v39 = vld [vmem:[#allocation8 + $0xac] ss:$16 sps:$4 sm:$0xff]  }
  0x49   :  { %1154 = vmatmul.mubr.msk.bf16.vlgmr.msra.gmra.mxu0 %vm125_vm1, %v101_v5  ;;  %v1241_v26 = vld [vmem:[#allocation8 + $0x24] ss:$16 sps:$4 sm:$0xff]   ;;  %v1239_v27 = vld [vmem:[#allocation8 + $0x20] ss:$16 sps:$4 sm:$0xff]   ;;  %v1218_v40 = vld [vmem:[#allocation8 + $0xa8] ss:$16 sps:$4 sm:$0xff]  }
  0x4a   :  { %1162 = vmatpush3.bf16.msra.mxu1 %v1197_v7  ;;  %499 = vmatpush1.bf16.msra.mxu0 %v1203_v13  ;;  %v1226_v41 = vld [vmem:[#allocation8 + $0x8c] ss:$16 sps:$4 sm:$0xff]   ;;  %v1224_v42 = vld [vmem:[#allocation8 + $0x88] ss:$16 sps:$4 sm:$0xff]   ;;  %v1247_v49 = vld [vmem:[#allocation8 + $0x4] ss:$16 sps:$4 sm:$0xff]  }
  0x4b   :  { %1163 = vmatprep.subr.bf16.mxu1 %v1436_v0  ;;  %500 = vmatprep.subr.bf16.mxu0 %v1211_v16  ;;  %v1232_v43 = vld [vmem:[#allocation8 + $0x6c] ss:$16 sps:$4 sm:$0xff]   ;;  %v1230_v44 = vld [vmem:[#allocation8 + $0x68] ss:$16 sps:$4 sm:$0xff]   ;;  %v1245_v51 = vld [vmem:[#allocation8] ss:$16 sps:$4 sm:$0xff]  }
  0x4c   :  { %v1238_v45 = vld [vmem:[#allocation8 + $0x4c] ss:$16 sps:$4 sm:$0xff]   ;;  %v1236_v46 = vld [vmem:[#allocation8 + $0x48] ss:$16 sps:$4 sm:$0xff]   ;;  %530 = vmatprep.mubr.bf16.mxu0 %v1438_v53  ;;  %v1255_v1 = vld [vmem:[#allocation10 + $0x70] sm:$0xff]   ;;  %vm994_vm7 = vcmask 195584  }
  0x4d   :  { %v1244_v47 = vld [vmem:[#allocation8 + $0x2c] ss:$16 sps:$4 sm:$0xff]   ;;  %v1242_v48 = vld [vmem:[#allocation8 + $0x28] ss:$16 sps:$4 sm:$0xff]   ;;  %v1256_v2 = vld [vmem:[#allocation10 + $0xf0] sm:$0xff]   ;;  %s1442_s19 = smov [#allocation11]  }
  0x4e   :  { %1164 = vmatpush3.bf16.msra.mxu1 %v1198_v8  ;;  %501 = vmatpush1.bf16.msra.mxu0 %v1209_v17  ;;  %v1250_v50 = vld [vmem:[#allocation8 + $0xc] ss:$16 sps:$4 sm:$0xff]   ;;  %v1248_v52 = vld [vmem:[#allocation8 + $0x8] ss:$16 sps:$4 sm:$0xff]   ;;  %v1257_v4 = vld [vmem:[#allocation10 + $0x30] sm:$0xff]   ;;  %s1004_s20 = sshll.u32 %s1442_s19, 4  ;;  %s1005_s20 = int_to_ptr.vmem [resolvable:$true] %s1004_s20 }
  0x4f   :  { %1165 = vmatprep.subr.bf16.mxu1 %v1436_v0  ;;  %502 = vmatprep.subr.bf16.mxu0 %v1217_v18  ;;  %v1251_v54 = vld [vmem:[#allocation10 + $0x78] sm:$0xff]   ;;  %v1019_v56 = vld [vmem:[%s1544_s4] ss:$0 sm:$0xff]  ;;  %v1258_v5 = vld [vmem:[#allocation10 + $0xb0] sm:$0xff]   ;;  %s1399_s21 = scalar_lea.vmem %s1005_s20, 128  ;;  %p1404_p12 = scmp.lt.s32.totalorder %s1005_s20, %s1005_s20 }
  0x50   :  { %v1252_v55 = vld [vmem:[#allocation10 + $0xf8] sm:$0xff]   ;;  %v1259_v6 = vld [vmem:[#allocation10 + $0x68] sm:$0xff]   ;;  %v1266_v13 = vld [vmem:[#allocation10 + $0xa0] sm:$0xff]   ;;  %p1400_p11 = scmp.ne.s32.totalorder %s1005_s20, %s1399_s21  ;;  %p1405_p13 = scmp.lt.s32.totalorder %s1399_s21, %s1399_s21 }
  0x51   :  { %v1253_v62 = vld [vmem:[#allocation10 + $0x38] sm:$0xff]   ;;  %v1260_v7 = vld [vmem:[#allocation10 + $0xe8] sm:$0xff]   ;;  %v1271_v18 = vld [vmem:[#allocation10 + $0x50] sm:$0xff]  }
  0x52   :  { %1166 = vmatpush3.bf16.msra.mxu1 %v1199_v9  ;;  %503 = vmatpush1.bf16.msra.mxu0 %v1215_v19  ;;  %v1254_v63 = vld [vmem:[#allocation10 + $0xb8] sm:$0xff]   ;;  %v1261_v8 = vld [vmem:[#allocation10 + $0x28] sm:$0xff]   ;;  %v1272_v19 = vld [vmem:[#allocation10 + $0xd0] sm:$0xff]   ;;  %p1406_p0 = por %p1405_p13, %p1404_p12 }
  0x53   :  { %1167 = vmatprep.subr.bf16.mxu1 %v1436_v0  ;;  %504 = vmatprep.subr.bf16.mxu0 %v1223_v20  ;;  %v1262_v9 = vld [vmem:[#allocation10 + $0xa8] sm:$0xff]   ;;  %v1267_v14 = vld [vmem:[#allocation10 + $0x58] sm:$0xff]   ;;  %v1273_v20 = vld [vmem:[#allocation10 + $0x10] sm:$0xff]  }
  0x54   :  { %v1269_v16 = vld [vmem:[#allocation10 + $0x18] sm:$0xff]   ;;  %p1407_p1 = pnand %p1406_p0, %p1400_p11 }
  0x55   :  { %v1270_v17 = vld [vmem:[#allocation10 + $0x98] sm:$0xff]  }
  0x56   :  { %1168 = vmatpush3.bf16.msra.mxu1 %v1200_v10  ;;  %505 = vmatpush1.bf16.msra.mxu0 %v1221_v21  ;;  %v1263_v10 = vld [vmem:[#allocation10 + $0x60] sm:$0xff]   ;;  %v1274_v21 = vld [vmem:[#allocation10 + $0x90] sm:$0xff]  }
  0x57   :  { %1169 = vmatprep.subr.bf16.mxu1 %v1436_v0  ;;  %506 = vmatprep.subr.bf16.mxu0 %v1229_v22  ;;  %v1275_v22 = vld [vmem:[#allocation10 + $0x48] sm:$0xff]  }
  0x5a   :  { %1170 = vmatpush3.bf16.msra.mxu1 %v1201_v11  ;;  %507 = vmatpush1.bf16.msra.mxu0 %v1227_v23  ;;  %v1264_v11 = vld [vmem:[#allocation10 + $0xe0] sm:$0xff]   ;;  %v1276_v23 = vld [vmem:[#allocation10 + $0xc8] sm:$0xff]  }
  0x5b   :  { %1171 = vmatprep.subr.bf16.mxu1 %v1436_v0  ;;  %508 = vmatprep.subr.bf16.mxu0 %v1235_v24  ;;  %v1277_v24 = vld [vmem:[#allocation10 + $0x8] sm:$0xff]  }
  0x5e   :  { %1172 = vmatpush3.bf16.msra.mxu1 %v1202_v12  ;;  %509 = vmatpush1.bf16.msra.mxu0 %v1233_v25  ;;  %v1265_v12 = vld [vmem:[#allocation10 + $0x20] sm:$0xff]   ;;  %v1278_v25 = vld [vmem:[#allocation10 + $0x88] sm:$0xff]  }
  0x5f   :  { %539 = vmatprep.subr.bf16.mxu1 %v1208_v15  ;;  %510 = vmatprep.subr.bf16.mxu0 %v1241_v26  ;;  %v1268_v15 = vld [vmem:[#allocation10 + $0xd8] sm:$0xff]   ;;  %v1279_v26 = vld [vmem:[#allocation10 + $0x40] sm:$0xff]  }
  0x62   :  { %511 = vmatpush1.bf16.msra.mxu0 %v1239_v27  ;;  %v1280_v27 = vld [vmem:[#allocation10 + $0xc0] sm:$0xff]  }
  0x63   :  { %512 = vmatprep.subr.bf16.mxu0 %v1247_v49 }
  0x66   :  { %513 = vmatpush1.bf16.msra.mxu0 %v1245_v51 }
  0x67   :  { %1105 = vmatprep.subr.bf16.mxu0 %v1251_v54 }
 0x109   :  { %v163_v29 = vpop.f32.mrf.mxu0 }
 0x10a   :  { %v164_v30 = vadd.f32 %v1015_v28, %v163_v29  ;;  %v1281_v28 = vld [vmem:[#allocation10] sm:$0xff]  }
 0x10b   :  { %v1155_v31 = vpop.f32.mrf.mxu0  ;;  %v1282_v29 = vld [vmem:[#allocation10 + $0x80] sm:$0xff]  }
 0x10c   :  { %v169_v32 = vmax.f32 %v164_v30, 0.0  ;;  %v318_v30 = vlaneseq }
 0x10d   :  { %v166_v33 = vpop.f32.mrf.mxu0 }
 0x10e   :  { %v170_v35 = vpack.c.bf16 %v169_v32, %v169_v32  ;;  %v319_v31 = vshrl.u32 %v318_v30, 7 }
 0x10f   :  { %v1156_v37 = vpop.f32.mrf.mxu0 }
 0x110   :  { %1174 = vmatmul.mubr.bf16.vlgmr.msra.gmra.mxu1 %v170_v35  ;;  %v320_v32 = vsub.s32 0, %v319_v31  ;;  %v328_v33 = vsub.s32 2, %v319_v31  ;;  %v324_v35 = vsub.s32 1, %v319_v31 }
 0x111   :  { %540 = vmatpush1.bf16.msra.mxu1 %v1206_v34  ;;  %571 = vmatprep.mubr.bf16.mxu1 %v1438_v53  ;;  %v316_v34 = vld [vmem:[%s1546_s6] sm:$0xf] }
 0x112   :  { %541 = vmatprep.subr.bf16.mxu1 %v1214_v36  ;;  %v332_v36 = vsub.s32 3, %v319_v31  ;;  %v321_v37 = vrot.slane %v316_v34, %v320_v32 }
 0x115   :  { %542 = vmatpush1.bf16.msra.mxu1 %v1212_v38  ;;  %v329_v38 = vrot.slane %v316_v34, %v328_v33 }
 0x116   :  { %543 = vmatprep.subr.bf16.mxu1 %v1220_v39  ;;  %v325_v39 = vrot.slane %v316_v34, %v324_v35 }
 0x119   :  { %544 = vmatpush1.bf16.msra.mxu1 %v1218_v40  ;;  %v333_v40 = vrot.slane %v316_v34, %v332_v36 }
 0x11a   :  { %545 = vmatprep.subr.bf16.mxu1 %v1226_v41 }
 0x11d   :  { %546 = vmatpush1.bf16.msra.mxu1 %v1224_v42 }
 0x11e   :  { %547 = vmatprep.subr.bf16.mxu1 %v1232_v43 }
 0x121   :  { %548 = vmatpush1.bf16.msra.mxu1 %v1230_v44 }
 0x122   :  { %549 = vmatprep.subr.bf16.mxu1 %v1238_v45 }
 0x125   :  { %550 = vmatpush1.bf16.msra.mxu1 %v1236_v46 }
 0x126   :  { %551 = vmatprep.subr.bf16.mxu1 %v1244_v47 }
 0x129   :  { %552 = vmatpush1.bf16.msra.mxu1 %v1242_v48 }
 0x12a   :  { %553 = vmatprep.subr.bf16.mxu1 %v1250_v50 }
 0x12d   :  { %554 = vmatpush1.bf16.msra.mxu1 %v1248_v52 }
 0x12e   :  { %1127 = vmatprep.subr.bf16.mxu1 %v1252_v55 }
 0x1d0   :  { %v276_v57 = vpop.f32.mrf.mxu1 }
 0x1d1   :  { %v277_v58 = vadd.f32 %v1019_v56, %v276_v57 }
 0x1d2   :  { %v1175_v59 = vpop.f32.mrf.mxu1 }
 0x1d3   :  { %v282_v60 = vmax.f32 %v277_v58, 0.0 }
 0x1d4   :  { %v279_v61 = vpop.f32.mrf.mxu1 }
 0x1d5   :  { %v283_v0 = vpack.c.bf16 %v282_v60, %v282_v60 }
 0x1d6   :  { %v1176_v3 = vpop.f32.mrf.mxu1 }
 0x1d7   :  { %531 = vmatmul.mubr.bf16.vlgmr.msra.gmra.mxu0 %v283_v0  ;;  %572 = vmatmul.mubr.bf16.vlgmr.msra.gmra.mxu1 %v283_v0 }
 0x1d8   :  { %1106 = vmatpush3.bf16.msra.mxu0 %v1253_v62  ;;  %1128 = vmatpush3.bf16.msra.mxu1 %v1254_v63  ;;  %v1060_v63 = vld [vmem:[%s1548_s8] ss:$0 sm:$0xff]  ;;  %s1439_s8 = smov 120  }
 0x1d9   :  { %1107 = vmatprep.subr.bf16.mxu0 %v1255_v1  ;;  %1129 = vmatprep.subr.bf16.mxu1 %v1256_v2 }
 0x1dc   :  { %1108 = vmatpush3.bf16.msra.mxu0 %v1257_v4  ;;  %1130 = vmatpush3.bf16.msra.mxu1 %v1258_v5 }
 0x1dd   :  { %1109 = vmatprep.subr.bf16.mxu0 %v1259_v6  ;;  %1131 = vmatprep.subr.bf16.mxu1 %v1260_v7 }
 0x1e0   :  { %1110 = vmatpush3.bf16.msra.mxu0 %v1261_v8  ;;  %1132 = vmatpush3.bf16.msra.mxu1 %v1262_v9 }
 0x1e1   :  { %1111 = vmatprep.subr.bf16.mxu0 %v1263_v10  ;;  %1133 = vmatprep.subr.bf16.mxu1 %v1264_v11 }
 0x1e4   :  { %1112 = vmatpush3.bf16.msra.mxu0 %v1265_v12  ;;  %1134 = vmatpush3.bf16.msra.mxu1 %v1266_v13 }
 0x1e5   :  { %1113 = vmatprep.subr.bf16.mxu0 %v1267_v14  ;;  %1135 = vmatprep.subr.bf16.mxu1 %v1268_v15 }
 0x1e8   :  { %1114 = vmatpush3.bf16.msra.mxu0 %v1269_v16  ;;  %1136 = vmatpush3.bf16.msra.mxu1 %v1270_v17 }
 0x1e9   :  { %1115 = vmatprep.subr.bf16.mxu0 %v1271_v18  ;;  %1137 = vmatprep.subr.bf16.mxu1 %v1272_v19 }
 0x1ec   :  { %1116 = vmatpush3.bf16.msra.mxu0 %v1273_v20  ;;  %1138 = vmatpush3.bf16.msra.mxu1 %v1274_v21 }
 0x1ed   :  { %1117 = vmatprep.subr.bf16.mxu0 %v1275_v22  ;;  %1139 = vmatprep.subr.bf16.mxu1 %v1276_v23 }
 0x1f0   :  { %1118 = vmatpush3.bf16.msra.mxu0 %v1277_v24  ;;  %1140 = vmatpush3.bf16.msra.mxu1 %v1278_v25 }
 0x1f1   :  { %1119 = vmatprep.subr.bf16.mxu0 %v1279_v26  ;;  %1141 = vmatprep.subr.bf16.mxu1 %v1280_v27 }
 0x1f4   :  { %1120 = vmatpush3.bf16.msra.mxu0 %v1281_v28  ;;  %1142 = vmatpush3.bf16.msra.mxu1 %v1282_v29 }
 0x297   :  { %v532_v41 = vpop.f32.mrf.mxu0  ;;  %v573_v42 = vpop.f32.mrf.mxu1 }
 0x298   :  { %v533_v43 = vadd.f32 %v532_v41, %v321_v37  ;;  %v574_v44 = vadd.f32 %v573_v42, %v329_v38 }
 0x299   :  { %v534_v45 = vpop.f32.mrf.mxu0  ;;  %v575_v46 = vpop.f32.mrf.mxu1 }
 0x29a   :  { %v535_v47 = vadd.f32 %v534_v45, %v325_v39  ;;  %v576_v48 = vadd.f32 %v575_v46, %v333_v40  ;;  %v580_v49 = vmax.f32 %v533_v43, 0.0  ;;  %v582_v50 = vmax.f32 %v574_v44, 0.0 }
 0x29b   :  { %v536_v51 = vpop.f32.mrf.mxu0  ;;  %v577_v52 = vpop.f32.mrf.mxu1 }
 0x29c   :  { %v581_v53 = vmax.f32 %v535_v47, 0.0  ;;  %v583_v54 = vmax.f32 %v576_v48, 0.0  ;;  %v584_v59 = vpack.c.bf16 %v580_v49, %v580_v49  ;;  %v586_v60 = vpack.c.bf16 %v582_v50, %v582_v50 }
 0x29d   :  { %v537_v55 = vpop.f32.mrf.mxu0  ;;  %v578_v56 = vpop.f32.mrf.mxu1 }
 0x29e   :  { %v585_v57 = vpack.c.bf16 %v581_v53, %v581_v53  ;;  %v587_v58 = vpack.c.bf16 %v583_v54, %v583_v54 }
 0x2a0   :  { %883 = vmatprep.mubr.bf16.mxu0 %v585_v57  ;;  %923 = vmatprep.mubr.bf16.mxu1 %v587_v58 }
 0x2a1   :  { %884 = vmatmul.mubr.bf16.vlgmr.msra.gmra.mxu0 %v584_v59  ;;  %924 = vmatmul.mubr.bf16.vlgmr.msra.gmra.mxu1 %v586_v60 }
 0x361   :  { %v1121_v61 = vpop.f32.mrf.mxu0  ;;  %v1143_v62 = vpop.f32.mrf.mxu1 }
 0x363   :  { %v1122_v0 = vpop.f32.mrf.mxu0  ;;  %v1144_v1 = vpop.f32.mrf.mxu1 }
 0x364   :  { %v1123_v2 = vadd.f32 %v1122_v0, %v1121_v61  ;;  %v1145_v6 = vadd.f32 %v1144_v1, %v1143_v62 }
 0x365   :  { %v1124_v3 = vpop.f32.mrf.mxu0  ;;  %v1146_v4 = vpop.f32.mrf.mxu1 }
 0x366   :  { %v886_v5 = vadd.f32 %v1123_v2, %v1060_v63 }
 0x367   :  { %v1125_v7 = vpop.f32.mrf.mxu0  ;;  %v1147_v8 = vpop.f32.mrf.mxu1 }
 0x368   :  { %v926_v9 = vadd.f32 %v1145_v6, %v886_v5 }
 0x36a   :  { %v976_v10 = vsel %vm975_vm2, %v926_v9, -inf  ;;  %v944_v11 = vsel %vm943_vm3, %v926_v9, -inf  ;;  %v960_v12 = vsel %vm959_vm4, %v926_v9, -inf  ;;  %v932_v13 = vsel %vm931_vm5, %v926_v9, -inf }
 0x36b   :  { %977 = vmax.xlane.f32.xlu1 %v976_v10  ;;  %945 = vmax.xlane.f32.xlu0 %v944_v11 }
 0x36f   :  { %961 = vmax.xlane.f32.xlu0 %v960_v12  ;;  %933 = vmax.xlane.f32.xlu1 %v932_v13 }
 0x3f4   :  { %v946_v14 = vpop.xlane.xlu0 %945  ;;  %v978_v16 = vpop.xlane.xlu1 %977 }
 0x3f5   :  { %v947_v15 = vsub.f32 %v926_v9, %v946_v14  ;;  %v979_v19 = vsub.f32 %v926_v9, %v978_v16 }
 0x3f7   :  { %v948_v17 = vmul.f32 1.442695, %v947_v15  ;;  %v980_v22 = vmul.f32 1.442695, %v979_v19 }
 0x3f8   :  { %v962_v18 = vpop.xlane.xlu0 %961  ;;  %v934_v26 = vpop.xlane.xlu1 %933 }
 0x3f9   :  { %v963_v20 = vsub.f32 %v926_v9, %v962_v18  ;;  %1283 = vpow2.f32 %v948_v17  ;;  %v935_v27 = vsub.f32 %v926_v9, %v934_v26 }
 0x3fb   :  { %v964_v21 = vmul.f32 1.442695, %v963_v20  ;;  %v936_v28 = vmul.f32 1.442695, %v935_v27 }
 0x3fd   :  { %1285 = vpow2.f32 %v964_v21 }
 0x3fe   :  { %1287 = vpow2.f32 %v980_v22 }
 0x3ff   :  { %1289 = vpow2.f32 %v936_v28 }
 0x406   :  { %v1284_v23 = vpop.eup %1283 }
 0x407   :  { %951 = vrot.lane.b32.xlu0 %v1284_v23, %s1439_s8 }
 0x40a   :  { %v1286_v24 = vpop.eup %1285 }
 0x40b   :  { %967 = vrot.lane.b32.xlu1 %v1286_v24, %s1440_s17  ;;  %v1288_v25 = vpop.eup %1287 }
 0x40c   :  { %v1290_v29 = vpop.eup %1289 }
 0x40d   :  { %v938_v30 = vsel %vm931_vm5, %v1290_v29, 0.0 }
 0x40f   :  { %983 = vrot.lane.b32.xlu1 %v1288_v25, %s1441_s18 }
 0x433   :  { %939 = vadd.xlane.f32.xlu1 %v938_v30 }
 0x479   :  { %v952_v31 = vpop.permute.xlu0 %951 }
 0x47a   :  { %v954_v32 = vsel %vm931_vm5, %v952_v31, 0.0 }
 0x47b   :  { %955 = vadd.xlane.f32.xlu0 %v954_v32 }
 0x47d   :  { %v968_v33 = vpop.permute.xlu1 %967 }
 0x47e   :  { %v970_v34 = vsel %vm931_vm5, %v968_v33, 0.0 }
 0x47f   :  { %971 = vadd.xlane.f32.xlu0 %v970_v34 }
 0x481   :  { %v984_v35 = vpop.permute.xlu1 %983 }
 0x482   :  { %v986_v36 = vsel %vm931_vm5, %v984_v35, 0.0 }
 0x483   :  { %987 = vadd.xlane.f32.xlu0 %v986_v36 }
 0x4bc   :  { %v940_v38 = vpop.xlane.xlu1 %939 }
 0x504   :  { %v956_v37 = vpop.xlane.xlu0 %955 }
 0x505   :  { %1291 = vrcp.f32 %v956_v37 }
 0x506   :  { %1293 = vrcp.f32 %v940_v38 }
 0x508   :  { %v972_v39 = vpop.xlane.xlu0 %971 }
 0x509   :  { %1295 = vrcp.f32 %v972_v39 }
 0x50c   :  { %v988_v40 = vpop.xlane.xlu0 %987 }
 0x50d   :  { %1297 = vrcp.f32 %v988_v40 }
 0x512   :  { %v1292_v41 = vpop.eup %1291 }
 0x513   :  { %v1294_v42 = vpop.eup %1293  ;;  %v958_v44 = vmul.f32 %v1292_v41, %v1284_v23 }
 0x514   :  { %v942_v46 = vmul.f32 %v1294_v42, %v1290_v29 }
 0x516   :  { %v1296_v43 = vpop.eup %1295  ;;  %v991_v49 = vsel %vm931_vm5, %v942_v46, %v958_v44 }
 0x517   :  { %v974_v45 = vmul.f32 %v1296_v43, %v1286_v24 }
 0x519   :  { %v993_v50 = vsel %vm992_vm6, %v991_v49, %v974_v45 }
 0x51a   :  { %v1298_v47 = vpop.eup %1297 }
 0x51b   :  { %v990_v48 = vmul.f32 %v1298_v47, %v1288_v25 }
 0x51d   :  { %v995_v51 = vsel %vm994_vm7, %v993_v50, %v990_v48 }
 0x51e   :  { %v996_v52 = vsel %vm125_vm1, %v995_v51, 0.0 }
 0x51f   :  { %997 = vst [vmem:[#allocation11] sm:$0xff] %v996_v52 }
 0x520   :  { %1410 = shalt.err (!%p1407_p1)
}
 0x521   :  { %1007 = dma.vmem_to_hbm [thread:$0]  %s1005_s20, 128, %s1549_s9, [#allocation4]  }
 0x522   :  { %1425 = dma.done.wait [#allocation4], 128  }
 0x523   :  { %1426 = vsyncadd [#allocation4], 4294967168 }
 0x524   :  { %1011 = vsyncpa [#allocation3], 1 }
 0x525   :  { %1012 = vsyncpa [#allocation6], 1 }
 0x526   :  { %1013 = vsyncpa [#allocation9], 1 }
 0x527   :  { %1014 = vsyncpa [#allocation4], 1 }

</bundles_post_ra>
